<compile_context>
chip_gen: v6e
topology: v6e:2x2x1
jax: 0.10.0
libtpu: 0.0.40
codegen_flags: <defaults>
</compile_context>

<pallas_src>
import functools
import math

import jax
import jax.numpy as jnp
from jax.experimental import pallas as pl
from jax.experimental.pallas import tpu as pltpu

_EPS = 1e-5          # PyTorch GroupNorm default eps
_LANE = 128
MXU_DTYPE = jnp.bfloat16   # matmul operand dtype (accumulation stays f32)

# (dim, kernel, stride) -- synthetic small "args" standing in for checkpoint['args']
FEATURE_LAYERS = [(32, 4, 2), (32, 4, 2), (32, 3, 1)]   # conv_feature_layers
AGG_LAYERS = [(32, 3, 1), (32, 3, 1)]                    # conv_aggregator_layers
RESIDUAL_SCALE = math.sqrt(0.5)                          # fairseq residual_scale=0.5 (sqrt applied)


def _round_up(x, m):
    return (x + m - 1) // m * m


def _conv_out_len(t, k, s):
    return (t - k) // s + 1


def _pad_lanes_to(v, target):
    """Right-pad the lane (time) axis of a 2-D value with zeros to `target`."""
    pad = target - v.shape[-1]
    if pad == 0:
        return v
    return jnp.concatenate([v, jnp.zeros((v.shape[0], pad), v.dtype)], axis=1)


# ---------------------------------------------------------------------------
# In-kernel building blocks (operate on VMEM-resident values)
# ---------------------------------------------------------------------------
def _gn_relu(pieces, g_ref, b_ref):
    """Single-pass GroupNorm(num_groups=1, biased var, affine) + ReLU.

    Stats are taken jointly over all `pieces` (list of (C, T_i) f32 values), so
    phase-split activations get exactly the same statistics as the interleaved
    tensor.  gamma*rsqrt(var+eps) is folded into one scale and beta-mean*scale
    into one shift -> one FMA + ReLU per piece.
    """
    n = float(sum(p.shape[0] * p.shape[1] for p in pieces))
    s = 0.0
    ss = 0.0
    for p in pieces:
        s = s + jnp.sum(p)
        ss = ss + jnp.sum(p * p)
    mean = s / n
    var = ss / n - mean * mean
    scale = g_ref[...] * jax.lax.rsqrt(var + _EPS)      # (C, 1)
    shift = b_ref[...] - mean * scale                   # (C, 1)
    return [jnp.maximum(p * scale + shift, 0.0) for p in pieces]


def _tapstack_dot(w_ref, slices):
    """One MXU matmul per conv layer: (C_out, K*C_in) @ (K*C_in, T).

    `slices` are the K shifted (C_in, T) activation views; they are stacked
    along the sublane axis (tap-major / channel-minor, matching the wrapper's
    weight flattening).  Operands are bf16, accumulation is f32.
    """
    xk = jnp.concatenate(slices, axis=0).astype(w_ref.dtype)
    return jnp.dot(w_ref[...], xk, preferred_element_type=jnp.float32)


def _conv1_gn_relu(h, w_ref, g_ref, b_ref, k):
    """Stride-1 Conv1d(bias=False) -> GroupNorm -> ReLU on a resident value."""
    t_out = h.shape[1] - k + 1
    y = _tapstack_dot(w_ref, [h[:, tap:tap + t_out] for tap in range(k)])
    return _gn_relu([y], g_ref, b_ref)[0]


def _wav2vec_fused_kernel(*refs, feat_cfg, agg_cfg, t0):
    """One grid step == one batch sample; the entire conv stack stays in VMEM."""
    n_layers = len(feat_cfg) + len(agg_cfg)
    x_ref = refs[0]
    layer_refs = [refs[1 + 3 * i: 4 + 3 * i] for i in range(n_layers)]
    z_ref, c_ref = refs[1 + 3 * n_layers], refs[2 + 3 * n_layers]

    # ---------------- feature_extractor ----------------
    (_d0, k0, s0), (_d1, k1, s1) = feat_cfg[0], feat_cfg[1]
    t1 = _conv_out_len(t0, k0, s0)
    t1_e, t1_o = (t1 + 1) // 2, t1 // 2          # even / odd output phases of layer 0

    xp = x_ref[0].astype(jnp.float32)            # (4, ceil(T0/4)) polyphase waveform
    w0_ref, g0_ref, b0_ref = layer_refs[0]

    # Layer 0 (C_in=1, k=4, stride 2): broadcast VPU FMAs in f32 (rank-1
    # contraction would waste the MXU; v5e VPU has no bf16).  Output is produced
    # directly in even/odd phase form so the next stride-2 layer needs only
    # unit-stride slices — no full-rate intermediate, no decimation matmul.
    w0 = w0_ref[...]                             # (C0, k0) f32
    c0 = w0.shape[0]
    acc_e = jnp.zeros((c0, t1_e), jnp.float32)
    acc_o = jnp.zeros((c0, t1_o), jnp.float32)
    for tap in range(k0):
        col = w0[:, tap:tap + 1]                                 # (C0, 1)
        pe, oe = tap % 4, tap // 4                               # even out j reads x[4j + tap]
        po, oo = (tap + 2) % 4, (tap + 2) // 4                   # odd  out j reads x[4j + 2 + tap]
        acc_e = acc_e + col * xp[pe:pe + 1, oe:oe + t1_e]
        acc_o = acc_o + col * xp[po:po + 1, oo:oo + t1_o]
    h_e, h_o = _gn_relu([acc_e, acc_o], g0_ref, b0_ref)

    # Layer 1 (k=4, stride 2): tap-stacked single matmul over the phase-split
    # input (tap t reads the even phase if t is even, odd phase otherwise).
    t2 = _conv_out_len(t1, k1, s1)
    w1_ref, g1_ref, b1_ref = layer_refs[1]
    slices = []
    for tap in range(k1):
        src = h_e if tap % 2 == 0 else h_o
        off = tap // 2
        slices.append(src[:, off:off + t2])
    y = _tapstack_dot(w1_ref, slices)
    h = _gn_relu([y], g1_ref, b1_ref)[0]

    # Remaining stride-1 feature layers.
    for (w_ref, g_ref, b_ref), (_d, k, _s) in zip(layer_refs[2:len(feat_cfg)], feat_cfg[2:]):
        h = _conv1_gn_relu(h, w_ref, g_ref, b_ref, k)
    z = h                                        # (C, T_z)

    # ---------------- feature_aggregator ----------------
    # Causal (left replication-pad) convs + sqrt(0.5)-scaled residual; residual
    # reuses the resident value (z/c read from HBM zero extra times).
    c = z
    for (w_ref, g_ref, b_ref), (_d, k, _s) in zip(layer_refs[len(feat_cfg):], agg_cfg):
        ka = k // 2
        kb = ka - 1 if k % 2 == 0 else ka
        npad = ka + kb
        # TODO(synk): at realistic 16 kHz lengths, patch only the first npad
        #             output columns instead of a full-width lane concatenation.
        c_pad = jnp.concatenate([c[:, :1]] * npad + [c], axis=1)
        y = _conv1_gn_relu(c_pad, w_ref, g_ref, b_ref, k)
        c = (y + c) * RESIDUAL_SCALE

    # Lane-dense stores: time axis zero-padded to a multiple of 128 lanes
    # (unmasked vst); the wrapper slices the padding back off.
    z_ref[0] = _pad_lanes_to(z, z_ref.shape[-1]).astype(z_ref.dtype)
    c_ref[0] = _pad_lanes_to(c, c_ref.shape[-1]).astype(c_ref.dtype)


# ---------------------------------------------------------------------------
# Wrapper: single fused pallas_call
# ---------------------------------------------------------------------------
def wav2vec_forward(params, x):
    """x: (B, T) raw waveform -> (z, c), both (B, C, T_out)."""
    B, T0 = x.shape
    (_d0, k0, s0), (_d1, k1, s1) = FEATURE_LAYERS[0], FEATURE_LAYERS[1]
    assert s0 == 2 and s1 == 2 and k0 == 4 and k1 == 4, \
        "polyphase path assumes two leading k=4, stride=2 feature layers"
    assert all(s == 1 for (_d, _k, s) in FEATURE_LAYERS[2:] + AGG_LAYERS)
    assert FEATURE_LAYERS[-1][0] == AGG_LAYERS[-1][0]

    t = T0
    for (_d, k, s) in FEATURE_LAYERS:
        t = _conv_out_len(t, k, s)
    t_valid = t                                  # aggregator is length-preserving
    t_padded = _round_up(t_valid, _LANE)
    c_dim = FEATURE_LAYERS[-1][0]

    # 4-phase waveform (phase p = x[:, p::4]); padding samples are never read by
    # valid conv outputs.  This is what lets both stride-2 layers run with
    # unit-stride in-kernel access and no decimation matmul.
    T0p = _round_up(T0, 4)
    x_pad = jnp.pad(x, ((0, 0), (0, T0p - T0)))
    x_ph = x_pad.reshape(B, T0p // 4, 4).transpose(0, 2, 1)     # (B, 4, T0p//4)

    inputs = [x_ph]
    in_specs = [pl.BlockSpec((1, 4, T0p // 4), lambda b: (b, 0, 0))]
    for li, p in enumerate(params["feat"] + params["agg"]):
        c_out, c_in, k = p["w"].shape
        # tap-major / channel-minor flattening -> one (C_out, K*C_in) matrix per layer
        w_flat = jnp.transpose(p["w"], (0, 2, 1)).reshape(c_out, k * c_in)
        # layer 0 runs as f32 VPU FMAs; the matmul layers feed the MXU in bf16
        w_flat = w_flat.astype(jnp.float32 if li == 0 else MXU_DTYPE)
        g = p["gamma"].reshape(-1, 1).astype(jnp.float32)
        bt = p["beta"].reshape(-1, 1).astype(jnp.float32)
        for arr in (w_flat, g, bt):
            inputs.append(arr)
            # constant block index -> fetched into VMEM once, resident across the grid
            in_specs.append(pl.BlockSpec(arr.shape, lambda b, _n=arr.ndim: (0,) * _n))

    kernel = functools.partial(_wav2vec_fused_kernel,
                               feat_cfg=tuple(FEATURE_LAYERS),
                               agg_cfg=tuple(AGG_LAYERS),
                               t0=T0)

    # TODO(synk): for real 16 kHz audio (T ~ 1e5) the time axis must be tiled
    #             (K-1 halo, streamed sum/sumsq GN accumulators over an
    #             'arbitrary' axis) and several samples should be packed along
    #             the lane/N dim with segment-GN to fill the 256-wide MXU;
    #             whole-sample residency only works at these toy lengths.
    z_p, c_p = pl.pallas_call(
        kernel,
        out_shape=(jax.ShapeDtypeStruct((B, c_dim, t_padded), x.dtype),
                   jax.ShapeDtypeStruct((B, c_dim, t_padded), x.dtype)),
        grid=(B,),
        in_specs=in_specs,
        out_specs=(pl.BlockSpec((1, c_dim, t_padded), lambda b: (b, 0, 0)),
                   pl.BlockSpec((1, c_dim, t_padded), lambda b: (b, 0, 0))),
        compiler_params=pltpu.CompilerParams(
            dimension_semantics=("parallel",),
            vmem_limit_bytes=32 * 1024 * 1024),   # explicit budget (v5e default 16 MiB, v7x physical 64 MiB)
    )(*inputs)

    return z_p[:, :, :t_valid], c_p[:, :, :t_valid]


# ---------------------------------------------------------------------------
# Parameter init + pure-JAX references (for correctness checking)
# ---------------------------------------------------------------------------
def init_params(key):
    params = {"feat": [], "agg": []}
    c_in = 1
    for (dim, k, _s) in FEATURE_LAYERS:
        key, wk = jax.random.split(key)
        params["feat"].append({
            "w": jax.random.normal(wk, (dim, c_in, k), jnp.float32) * 0.1,
            "gamma": jnp.ones((dim,), jnp.float32),
            "beta": jnp.zeros((dim,), jnp.float32),
        })
        c_in = dim
    for (dim, k, _s) in AGG_LAYERS:
        key, wk = jax.random.split(key)
        params["agg"].append({
            "w": jax.random.normal(wk, (dim, c_in, k), jnp.float32) * 0.1,
            "gamma": jnp.ones((dim,), jnp.float32),
            "beta": jnp.zeros((dim,), jnp.float32),
        })
        c_in = dim
    return params


def _ref_conv_block(x, w, gamma, beta, stride, residual=None, mxu_dtype=None):
    B, Ci, T = x.shape
    Co, _, K = w.shape
    t_out = (T - K) // stride + 1
    cols = jnp.stack([x[:, :, tap:tap + stride * (t_out - 1) + 1:stride] for tap in range(K)],
                     axis=2)                                     # (B, Ci, K, t_out)
    if mxu_dtype is not None and Ci > 1:
        y = jnp.einsum('oik,bikt->bot', w.astype(mxu_dtype), cols.astype(mxu_dtype),
                       preferred_element_type=jnp.float32)
    else:
        y = jnp.einsum('oik,bikt->bot', w, cols)
    mean = y.mean(axis=(1, 2), keepdims=True)
    var = jnp.square(y - mean).mean(axis=(1, 2), keepdims=True)
    y = (y - mean) * jax.lax.rsqrt(var + _EPS)
    y = y * gamma[None, :, None] + beta[None, :, None]
    y = jnp.maximum(y, 0.0)
    if residual is not None:
        y = (y + residual) * RESIDUAL_SCALE
    return y


def wav2vec_forward_ref(params, x, mxu_dtype=None):
    h = x[:, None, :]
    for (_d, _k, s), p in zip(FEATURE_LAYERS, params["feat"]):
        h = _ref_conv_block(h, p["w"], p["gamma"], p["beta"], s, mxu_dtype=mxu_dtype)
    z = h
    c = z
    for (_d, k, s), p in zip(AGG_LAYERS, params["agg"]):
        ka = k // 2
        kb = ka - 1 if k % 2 == 0 else ka
        c_pad = jnp.pad(c, ((0, 0), (0, 0), (ka + kb, 0)), mode="edge")
        c = _ref_conv_block(c_pad, p["w"], p["gamma"], p["beta"], s,
                            residual=c, mxu_dtype=mxu_dtype)
    return z, c


if __name__ == "__main__":
    key = jax.random.PRNGKey(0)
    pkey, xkey = jax.random.split(key)
    params = init_params(pkey)

    B, T_audio = 2, 256
    x = jax.random.normal(xkey, (B, T_audio), jnp.float32)   # raw waveform (B, T)

    z, c = jax.jit(wav2vec_forward)(params, x)
    jax.block_until_ready((z, c))

    # T: 256 -(k4,s2)-> 127 -(k4,s2)-> 62 -(k3,s1)-> 60 ; aggregator preserves length.
    assert z.shape == (B, 32, 60), z.shape
    assert c.shape == (B, 32, 60), c.shape
    assert z.dtype == jnp.float32 and c.dtype == jnp.float32

    # Tight check vs a reference using the same bf16 MXU operand precision.
    z_rb, c_rb = jax.jit(functools.partial(wav2vec_forward_ref, mxu_dtype=MXU_DTYPE))(params, x)
    assert jnp.allclose(z, z_rb, rtol=2e-3, atol=2e-3), float(jnp.max(jnp.abs(z - z_rb)))
    assert jnp.allclose(c, c_rb, rtol=2e-3, atol=2e-3), float(jnp.max(jnp.abs(c - c_rb)))

    # Loose sanity check vs the full-f32 reference (headroom for bf16 MXU quantization).
    z_r, c_r = jax.jit(wav2vec_forward_ref)(params, x)
    assert jnp.allclose(z, z_r, rtol=5e-2, atol=5e-2), float(jnp.max(jnp.abs(z - z_r)))
    assert jnp.allclose(c, c_r, rtol=5e-2, atol=5e-2), float(jnp.max(jnp.abs(c - c_r)))

    print("KERNEL_OK")
</pallas_src>

<mosaic_0001>
module attributes {stable_mosaic.version = 11 : i64} {
  func.func @_wav2vec_fused_kernel(%arg0: i32, %arg1: memref<1x4x64xf32, #tpu.memory_space<vmem>>, %arg2: memref<32x4xf32, #tpu.memory_space<vmem>>, %arg3: memref<32x1xf32, #tpu.memory_space<vmem>>, %arg4: memref<32x1xf32, #tpu.memory_space<vmem>>, %arg5: memref<32x128xbf16, #tpu.memory_space<vmem>>, %arg6: memref<32x1xf32, #tpu.memory_space<vmem>>, %arg7: memref<32x1xf32, #tpu.memory_space<vmem>>, %arg8: memref<32x96xbf16, #tpu.memory_space<vmem>>, %arg9: memref<32x1xf32, #tpu.memory_space<vmem>>, %arg10: memref<32x1xf32, #tpu.memory_space<vmem>>, %arg11: memref<32x96xbf16, #tpu.memory_space<vmem>>, %arg12: memref<32x1xf32, #tpu.memory_space<vmem>>, %arg13: memref<32x1xf32, #tpu.memory_space<vmem>>, %arg14: memref<32x96xbf16, #tpu.memory_space<vmem>>, %arg15: memref<32x1xf32, #tpu.memory_space<vmem>>, %arg16: memref<32x1xf32, #tpu.memory_space<vmem>>, %arg17: memref<1x32x128xf32, #tpu.memory_space<vmem>>, %arg18: memref<1x32x128xf32, #tpu.memory_space<vmem>>) attributes {dimension_semantics = [#tpu.dimension_semantics<parallel>], iteration_bounds = array<i64: 2>, scalar_prefetch = 0 : i64, scratch_operands = 0 : i64, tpu.core_type = #tpu.core_type<tc>, window_params = [{transform_indices = @transform_0, window_bounds = array<i64: 1, 4, 64>}, {pipeline_mode = #tpu.pipeline_mode<synchronous>, transform_indices = @transform_1, window_bounds = array<i64: 32, 4>}, {pipeline_mode = #tpu.pipeline_mode<synchronous>, transform_indices = @transform_2, window_bounds = array<i64: 32, 1>}, {pipeline_mode = #tpu.pipeline_mode<synchronous>, transform_indices = @transform_3, window_bounds = array<i64: 32, 1>}, {pipeline_mode = #tpu.pipeline_mode<synchronous>, transform_indices = @transform_4, window_bounds = array<i64: 32, 128>}, {pipeline_mode = #tpu.pipeline_mode<synchronous>, transform_indices = @transform_5, window_bounds = array<i64: 32, 1>}, {pipeline_mode = #tpu.pipeline_mode<synchronous>, transform_indices = @transform_6, window_bounds = array<i64: 32, 1>}, {pipeline_mode = #tpu.pipeline_mode<synchronous>, transform_indices = @transform_7, window_bounds = array<i64: 32, 96>}, {pipeline_mode = #tpu.pipeline_mode<synchronous>, transform_indices = @transform_8, window_bounds = array<i64: 32, 1>}, {pipeline_mode = #tpu.pipeline_mode<synchronous>, transform_indices = @transform_9, window_bounds = array<i64: 32, 1>}, {pipeline_mode = #tpu.pipeline_mode<synchronous>, transform_indices = @transform_10, window_bounds = array<i64: 32, 96>}, {pipeline_mode = #tpu.pipeline_mode<synchronous>, transform_indices = @transform_11, window_bounds = array<i64: 32, 1>}, {pipeline_mode = #tpu.pipeline_mode<synchronous>, transform_indices = @transform_12, window_bounds = array<i64: 32, 1>}, {pipeline_mode = #tpu.pipeline_mode<synchronous>, transform_indices = @transform_13, window_bounds = array<i64: 32, 96>}, {pipeline_mode = #tpu.pipeline_mode<synchronous>, transform_indices = @transform_14, window_bounds = array<i64: 32, 1>}, {pipeline_mode = #tpu.pipeline_mode<synchronous>, transform_indices = @transform_15, window_bounds = array<i64: 32, 1>}, {transform_indices = @transform_16, window_bounds = array<i64: 1, 32, 128>}, {transform_indices = @transform_17, window_bounds = array<i64: 1, 32, 128>}]} {
    %c0 = arith.constant 0 : index
    %c0_0 = arith.constant 0 : index
    %c0_1 = arith.constant 0 : index
    %0 = vector.load %arg1[%c0, %c0_0, %c0_1] : memref<1x4x64xf32, #tpu.memory_space<vmem>>, vector<1x4x64xf32>
    %1 = vector.shape_cast %0 : vector<1x4x64xf32> to vector<4x64xf32>
    %c0_2 = arith.constant 0 : index
    %c0_3 = arith.constant 0 : index
    %2 = vector.load %arg2[%c0_2, %c0_3] : memref<32x4xf32, #tpu.memory_space<vmem>>, vector<32x4xf32>
    %cst = arith.constant 0.000000e+00 : f32
    %3 = vector.broadcast %cst : f32 to vector<32x64xf32>
    %cst_4 = arith.constant 0.000000e+00 : f32
    %4 = vector.broadcast %cst_4 : f32 to vector<32x63xf32>
    %5 = vector.extract_strided_slice %2 {offsets = [0, 0], sizes = [32, 1], strides = [1, 1]} : vector<32x4xf32> to vector<32x1xf32>
    %6 = vector.extract_strided_slice %1 {offsets = [0, 0], sizes = [1, 64], strides = [1, 1]} : vector<4x64xf32> to vector<1x64xf32>
    %7 = vector.broadcast %5 : vector<32x1xf32> to vector<32x64xf32>
    %8 = vector.broadcast %6 : vector<1x64xf32> to vector<32x64xf32>
    %9 = arith.mulf %7, %8 : vector<32x64xf32>
    %10 = arith.addf %3, %9 : vector<32x64xf32>
    %11 = vector.extract_strided_slice %1 {offsets = [2, 0], sizes = [1, 63], strides = [1, 1]} : vector<4x64xf32> to vector<1x63xf32>
    %12 = vector.broadcast %5 : vector<32x1xf32> to vector<32x63xf32>
    %13 = vector.broadcast %11 : vector<1x63xf32> to vector<32x63xf32>
    %14 = arith.mulf %12, %13 : vector<32x63xf32>
    %15 = arith.addf %4, %14 : vector<32x63xf32>
    %16 = vector.extract_strided_slice %2 {offsets = [0, 1], sizes = [32, 1], strides = [1, 1]} : vector<32x4xf32> to vector<32x1xf32>
    %17 = vector.extract_strided_slice %1 {offsets = [1, 0], sizes = [1, 64], strides = [1, 1]} : vector<4x64xf32> to vector<1x64xf32>
    %18 = vector.broadcast %16 : vector<32x1xf32> to vector<32x64xf32>
    %19 = vector.broadcast %17 : vector<1x64xf32> to vector<32x64xf32>
    %20 = arith.mulf %18, %19 : vector<32x64xf32>
    %21 = arith.addf %10, %20 : vector<32x64xf32>
    %22 = vector.extract_strided_slice %1 {offsets = [3, 0], sizes = [1, 63], strides = [1, 1]} : vector<4x64xf32> to vector<1x63xf32>
    %23 = vector.broadcast %16 : vector<32x1xf32> to vector<32x63xf32>
    %24 = vector.broadcast %22 : vector<1x63xf32> to vector<32x63xf32>
    %25 = arith.mulf %23, %24 : vector<32x63xf32>
    %26 = arith.addf %15, %25 : vector<32x63xf32>
    %27 = vector.extract_strided_slice %2 {offsets = [0, 2], sizes = [32, 1], strides = [1, 1]} : vector<32x4xf32> to vector<32x1xf32>
    %28 = vector.extract_strided_slice %1 {offsets = [2, 0], sizes = [1, 64], strides = [1, 1]} : vector<4x64xf32> to vector<1x64xf32>
    %29 = vector.broadcast %27 : vector<32x1xf32> to vector<32x64xf32>
    %30 = vector.broadcast %28 : vector<1x64xf32> to vector<32x64xf32>
    %31 = arith.mulf %29, %30 : vector<32x64xf32>
    %32 = arith.addf %21, %31 : vector<32x64xf32>
    %33 = vector.extract_strided_slice %1 {offsets = [0, 1], sizes = [1, 63], strides = [1, 1]} : vector<4x64xf32> to vector<1x63xf32>
    %34 = vector.broadcast %27 : vector<32x1xf32> to vector<32x63xf32>
    %35 = vector.broadcast %33 : vector<1x63xf32> to vector<32x63xf32>
    %36 = arith.mulf %34, %35 : vector<32x63xf32>
    %37 = arith.addf %26, %36 : vector<32x63xf32>
    %38 = vector.extract_strided_slice %2 {offsets = [0, 3], sizes = [32, 1], strides = [1, 1]} : vector<32x4xf32> to vector<32x1xf32>
    %39 = vector.extract_strided_slice %1 {offsets = [3, 0], sizes = [1, 64], strides = [1, 1]} : vector<4x64xf32> to vector<1x64xf32>
    %40 = vector.broadcast %38 : vector<32x1xf32> to vector<32x64xf32>
    %41 = vector.broadcast %39 : vector<1x64xf32> to vector<32x64xf32>
    %42 = arith.mulf %40, %41 : vector<32x64xf32>
    %43 = arith.addf %32, %42 : vector<32x64xf32>
    %44 = vector.extract_strided_slice %1 {offsets = [1, 1], sizes = [1, 63], strides = [1, 1]} : vector<4x64xf32> to vector<1x63xf32>
    %45 = vector.broadcast %38 : vector<32x1xf32> to vector<32x63xf32>
    %46 = vector.broadcast %44 : vector<1x63xf32> to vector<32x63xf32>
    %47 = arith.mulf %45, %46 : vector<32x63xf32>
    %48 = arith.addf %37, %47 : vector<32x63xf32>
    %49 = vector.shape_cast %43 : vector<32x64xf32> to vector<1x32x64xf32>
    %cst_5 = arith.constant dense<0.000000e+00> : vector<1xf32>
    %50 = vector.multi_reduction <add>, %49, %cst_5 [1, 2] : vector<1x32x64xf32> to vector<1xf32>
    %51 = vector.shape_cast %50 : vector<1xf32> to vector<1x1x1xf32>
    %52 = vector.extract %51[0, 0, 0] : f32 from vector<1x1x1xf32>
    %cst_6 = arith.constant 0.000000e+00 : f32
    %53 = arith.addf %cst_6, %52 : f32
    %54 = arith.mulf %43, %43 : vector<32x64xf32>
    %55 = vector.shape_cast %54 : vector<32x64xf32> to vector<1x32x64xf32>
    %cst_7 = arith.constant dense<0.000000e+00> : vector<1xf32>
    %56 = vector.multi_reduction <add>, %55, %cst_7 [1, 2] : vector<1x32x64xf32> to vector<1xf32>
    %57 = vector.shape_cast %56 : vector<1xf32> to vector<1x1x1xf32>
    %58 = vector.extract %57[0, 0, 0] : f32 from vector<1x1x1xf32>
    %cst_8 = arith.constant 0.000000e+00 : f32
    %59 = arith.addf %cst_8, %58 : f32
    %60 = vector.shape_cast %48 : vector<32x63xf32> to vector<1x32x63xf32>
    %cst_9 = arith.constant dense<0.000000e+00> : vector<1xf32>
    %61 = vector.multi_reduction <add>, %60, %cst_9 [1, 2] : vector<1x32x63xf32> to vector<1xf32>
    %62 = vector.shape_cast %61 : vector<1xf32> to vector<1x1x1xf32>
    %63 = vector.extract %62[0, 0, 0] : f32 from vector<1x1x1xf32>
    %64 = arith.addf %53, %63 : f32
    %65 = arith.mulf %48, %48 : vector<32x63xf32>
    %66 = vector.shape_cast %65 : vector<32x63xf32> to vector<1x32x63xf32>
    %cst_10 = arith.constant dense<0.000000e+00> : vector<1xf32>
    %67 = vector.multi_reduction <add>, %66, %cst_10 [1, 2] : vector<1x32x63xf32> to vector<1xf32>
    %68 = vector.shape_cast %67 : vector<1xf32> to vector<1x1x1xf32>
    %69 = vector.extract %68[0, 0, 0] : f32 from vector<1x1x1xf32>
    %70 = arith.addf %59, %69 : f32
    %cst_11 = arith.constant 4.064000e+03 : f32
    %71 = arith.divf %64, %cst_11 : f32
    %cst_12 = arith.constant 4.064000e+03 : f32
    %72 = arith.divf %70, %cst_12 : f32
    %73 = arith.mulf %71, %71 : f32
    %74 = arith.subf %72, %73 : f32
    %c0_13 = arith.constant 0 : index
    %c0_14 = arith.constant 0 : index
    %75 = vector.load %arg3[%c0_13, %c0_14] : memref<32x1xf32, #tpu.memory_space<vmem>>, vector<32x1xf32>
    %cst_15 = arith.constant 9.99999974E-6 : f32
    %76 = arith.addf %74, %cst_15 : f32
    %77 = math.rsqrt %76 : f32
    %78 = vector.broadcast %77 : f32 to vector<32x1xf32>
    %79 = arith.mulf %75, %78 : vector<32x1xf32>
    %c0_16 = arith.constant 0 : index
    %c0_17 = arith.constant 0 : index
    %80 = vector.load %arg4[%c0_16, %c0_17] : memref<32x1xf32, #tpu.memory_space<vmem>>, vector<32x1xf32>
    %81 = vector.broadcast %71 : f32 to vector<32x1xf32>
    %82 = arith.mulf %81, %79 : vector<32x1xf32>
    %83 = arith.subf %80, %82 : vector<32x1xf32>
    %84 = vector.broadcast %79 : vector<32x1xf32> to vector<32x64xf32>
    %85 = arith.mulf %43, %84 : vector<32x64xf32>
    %86 = vector.broadcast %83 : vector<32x1xf32> to vector<32x64xf32>
    %87 = arith.addf %85, %86 : vector<32x64xf32>
    %cst_18 = arith.constant 0.000000e+00 : f32
    %88 = vector.broadcast %cst_18 : f32 to vector<32x64xf32>
    %89 = arith.maximumf %87, %88 : vector<32x64xf32>
    %90 = vector.broadcast %79 : vector<32x1xf32> to vector<32x63xf32>
    %91 = arith.mulf %48, %90 : vector<32x63xf32>
    %92 = vector.broadcast %83 : vector<32x1xf32> to vector<32x63xf32>
    %93 = arith.addf %91, %92 : vector<32x63xf32>
    %cst_19 = arith.constant 0.000000e+00 : f32
    %94 = vector.broadcast %cst_19 : f32 to vector<32x63xf32>
    %95 = arith.maximumf %93, %94 : vector<32x63xf32>
    %96 = vector.extract_strided_slice %89 {offsets = [0, 0], sizes = [32, 62], strides = [1, 1]} : vector<32x64xf32> to vector<32x62xf32>
    %97 = vector.extract_strided_slice %95 {offsets = [0, 0], sizes = [32, 62], strides = [1, 1]} : vector<32x63xf32> to vector<32x62xf32>
    %98 = vector.extract_strided_slice %89 {offsets = [0, 1], sizes = [32, 62], strides = [1, 1]} : vector<32x64xf32> to vector<32x62xf32>
    %99 = vector.extract_strided_slice %95 {offsets = [0, 1], sizes = [32, 62], strides = [1, 1]} : vector<32x63xf32> to vector<32x62xf32>
    %100 = tpu.concatenate %96, %97, %98, %99 in 0 : vector<32x62xf32>, vector<32x62xf32>, vector<32x62xf32>, vector<32x62xf32> -> vector<128x62xf32>
    %101 = arith.truncf %100 : vector<128x62xf32> to vector<128x62xbf16>
    %c0_20 = arith.constant 0 : index
    %c0_21 = arith.constant 0 : index
    %102 = vector.load %arg5[%c0_20, %c0_21] : memref<32x128xbf16, #tpu.memory_space<vmem>>, vector<32x128xbf16>
    %cst_22 = arith.constant dense<0.000000e+00> : vector<32x62xf32>
    %103 = tpu.matmul %102, %101, %cst_22 {dimension_numbers = #tpu.dot_dimension_numbers<[1], [0], [0], [1], [0, 0, 1, 1], [], []>} : vector<32x128xbf16>, vector<128x62xbf16>, vector<32x62xf32> -> vector<32x62xf32>
    %104 = vector.shape_cast %103 : vector<32x62xf32> to vector<1x32x62xf32>
    %cst_23 = arith.constant dense<0.000000e+00> : vector<1xf32>
    %105 = vector.multi_reduction <add>, %104, %cst_23 [1, 2] : vector<1x32x62xf32> to vector<1xf32>
    %106 = vector.shape_cast %105 : vector<1xf32> to vector<1x1x1xf32>
    %107 = vector.extract %106[0, 0, 0] : f32 from vector<1x1x1xf32>
    %cst_24 = arith.constant 0.000000e+00 : f32
    %108 = arith.addf %cst_24, %107 : f32
    %109 = arith.mulf %103, %103 : vector<32x62xf32>
    %110 = vector.shape_cast %109 : vector<32x62xf32> to vector<1x32x62xf32>
    %cst_25 = arith.constant dense<0.000000e+00> : vector<1xf32>
    %111 = vector.multi_reduction <add>, %110, %cst_25 [1, 2] : vector<1x32x62xf32> to vector<1xf32>
    %112 = vector.shape_cast %111 : vector<1xf32> to vector<1x1x1xf32>
    %113 = vector.extract %112[0, 0, 0] : f32 from vector<1x1x1xf32>
    %cst_26 = arith.constant 0.000000e+00 : f32
    %114 = arith.addf %cst_26, %113 : f32
    %cst_27 = arith.constant 1.984000e+03 : f32
    %115 = arith.divf %108, %cst_27 : f32
    %cst_28 = arith.constant 1.984000e+03 : f32
    %116 = arith.divf %114, %cst_28 : f32
    %117 = arith.mulf %115, %115 : f32
    %118 = arith.subf %116, %117 : f32
    %c0_29 = arith.constant 0 : index
    %c0_30 = arith.constant 0 : index
    %119 = vector.load %arg6[%c0_29, %c0_30] : memref<32x1xf32, #tpu.memory_space<vmem>>, vector<32x1xf32>
    %cst_31 = arith.constant 9.99999974E-6 : f32
    %120 = arith.addf %118, %cst_31 : f32
    %121 = math.rsqrt %120 : f32
    %122 = vector.broadcast %121 : f32 to vector<32x1xf32>
    %123 = arith.mulf %119, %122 : vector<32x1xf32>
    %c0_32 = arith.constant 0 : index
    %c0_33 = arith.constant 0 : index
    %124 = vector.load %arg7[%c0_32, %c0_33] : memref<32x1xf32, #tpu.memory_space<vmem>>, vector<32x1xf32>
    %125 = vector.broadcast %115 : f32 to vector<32x1xf32>
    %126 = arith.mulf %125, %123 : vector<32x1xf32>
    %127 = arith.subf %124, %126 : vector<32x1xf32>
    %128 = vector.broadcast %123 : vector<32x1xf32> to vector<32x62xf32>
    %129 = arith.mulf %103, %128 : vector<32x62xf32>
    %130 = vector.broadcast %127 : vector<32x1xf32> to vector<32x62xf32>
    %131 = arith.addf %129, %130 : vector<32x62xf32>
    %cst_34 = arith.constant 0.000000e+00 : f32
    %132 = vector.broadcast %cst_34 : f32 to vector<32x62xf32>
    %133 = arith.maximumf %131, %132 : vector<32x62xf32>
    %134 = vector.extract_strided_slice %133 {offsets = [0, 0], sizes = [32, 60], strides = [1, 1]} : vector<32x62xf32> to vector<32x60xf32>
    %135 = vector.extract_strided_slice %133 {offsets = [0, 1], sizes = [32, 60], strides = [1, 1]} : vector<32x62xf32> to vector<32x60xf32>
    %136 = vector.extract_strided_slice %133 {offsets = [0, 2], sizes = [32, 60], strides = [1, 1]} : vector<32x62xf32> to vector<32x60xf32>
    %137 = tpu.concatenate %134, %135, %136 in 0 : vector<32x60xf32>, vector<32x60xf32>, vector<32x60xf32> -> vector<96x60xf32>
    %138 = arith.truncf %137 : vector<96x60xf32> to vector<96x60xbf16>
    %c0_35 = arith.constant 0 : index
    %c0_36 = arith.constant 0 : index
    %139 = vector.load %arg8[%c0_35, %c0_36] : memref<32x96xbf16, #tpu.memory_space<vmem>>, vector<32x96xbf16>
    %cst_37 = arith.constant dense<0.000000e+00> : vector<32x60xf32>
    %140 = tpu.matmul %139, %138, %cst_37 {dimension_numbers = #tpu.dot_dimension_numbers<[1], [0], [0], [1], [0, 0, 1, 1], [], []>} : vector<32x96xbf16>, vector<96x60xbf16>, vector<32x60xf32> -> vector<32x60xf32>
    %141 = vector.shape_cast %140 : vector<32x60xf32> to vector<1x32x60xf32>
    %cst_38 = arith.constant dense<0.000000e+00> : vector<1xf32>
    %142 = vector.multi_reduction <add>, %141, %cst_38 [1, 2] : vector<1x32x60xf32> to vector<1xf32>
    %143 = vector.shape_cast %142 : vector<1xf32> to vector<1x1x1xf32>
    %144 = vector.extract %143[0, 0, 0] : f32 from vector<1x1x1xf32>
    %cst_39 = arith.constant 0.000000e+00 : f32
    %145 = arith.addf %cst_39, %144 : f32
    %146 = arith.mulf %140, %140 : vector<32x60xf32>
    %147 = vector.shape_cast %146 : vector<32x60xf32> to vector<1x32x60xf32>
    %cst_40 = arith.constant dense<0.000000e+00> : vector<1xf32>
    %148 = vector.multi_reduction <add>, %147, %cst_40 [1, 2] : vector<1x32x60xf32> to vector<1xf32>
    %149 = vector.shape_cast %148 : vector<1xf32> to vector<1x1x1xf32>
    %150 = vector.extract %149[0, 0, 0] : f32 from vector<1x1x1xf32>
    %cst_41 = arith.constant 0.000000e+00 : f32
    %151 = arith.addf %cst_41, %150 : f32
    %cst_42 = arith.constant 1.920000e+03 : f32
    %152 = arith.divf %145, %cst_42 : f32
    %cst_43 = arith.constant 1.920000e+03 : f32
    %153 = arith.divf %151, %cst_43 : f32
    %154 = arith.mulf %152, %152 : f32
    %155 = arith.subf %153, %154 : f32
    %c0_44 = arith.constant 0 : index
    %c0_45 = arith.constant 0 : index
    %156 = vector.load %arg9[%c0_44, %c0_45] : memref<32x1xf32, #tpu.memory_space<vmem>>, vector<32x1xf32>
    %cst_46 = arith.constant 9.99999974E-6 : f32
    %157 = arith.addf %155, %cst_46 : f32
    %158 = math.rsqrt %157 : f32
    %159 = vector.broadcast %158 : f32 to vector<32x1xf32>
    %160 = arith.mulf %156, %159 : vector<32x1xf32>
    %c0_47 = arith.constant 0 : index
    %c0_48 = arith.constant 0 : index
    %161 = vector.load %arg10[%c0_47, %c0_48] : memref<32x1xf32, #tpu.memory_space<vmem>>, vector<32x1xf32>
    %162 = vector.broadcast %152 : f32 to vector<32x1xf32>
    %163 = arith.mulf %162, %160 : vector<32x1xf32>
    %164 = arith.subf %161, %163 : vector<32x1xf32>
    %165 = vector.broadcast %160 : vector<32x1xf32> to vector<32x60xf32>
    %166 = arith.mulf %140, %165 : vector<32x60xf32>
    %167 = vector.broadcast %164 : vector<32x1xf32> to vector<32x60xf32>
    %168 = arith.addf %166, %167 : vector<32x60xf32>
    %cst_49 = arith.constant 0.000000e+00 : f32
    %169 = vector.broadcast %cst_49 : f32 to vector<32x60xf32>
    %170 = arith.maximumf %168, %169 : vector<32x60xf32>
    %171 = vector.extract_strided_slice %170 {offsets = [0, 0], sizes = [32, 1], strides = [1, 1]} : vector<32x60xf32> to vector<32x1xf32>
    %172 = tpu.concatenate %171, %171, %170 in 1 : vector<32x1xf32>, vector<32x1xf32>, vector<32x60xf32> -> vector<32x62xf32>
    %173 = vector.extract_strided_slice %172 {offsets = [0, 0], sizes = [32, 60], strides = [1, 1]} : vector<32x62xf32> to vector<32x60xf32>
    %174 = vector.extract_strided_slice %172 {offsets = [0, 1], sizes = [32, 60], strides = [1, 1]} : vector<32x62xf32> to vector<32x60xf32>
    %175 = vector.extract_strided_slice %172 {offsets = [0, 2], sizes = [32, 60], strides = [1, 1]} : vector<32x62xf32> to vector<32x60xf32>
    %176 = tpu.concatenate %173, %174, %175 in 0 : vector<32x60xf32>, vector<32x60xf32>, vector<32x60xf32> -> vector<96x60xf32>
    %177 = arith.truncf %176 : vector<96x60xf32> to vector<96x60xbf16>
    %c0_50 = arith.constant 0 : index
    %c0_51 = arith.constant 0 : index
    %178 = vector.load %arg11[%c0_50, %c0_51] : memref<32x96xbf16, #tpu.memory_space<vmem>>, vector<32x96xbf16>
    %cst_52 = arith.constant dense<0.000000e+00> : vector<32x60xf32>
    %179 = tpu.matmul %178, %177, %cst_52 {dimension_numbers = #tpu.dot_dimension_numbers<[1], [0], [0], [1], [0, 0, 1, 1], [], []>} : vector<32x96xbf16>, vector<96x60xbf16>, vector<32x60xf32> -> vector<32x60xf32>
    %180 = vector.shape_cast %179 : vector<32x60xf32> to vector<1x32x60xf32>
    %cst_53 = arith.constant dense<0.000000e+00> : vector<1xf32>
    %181 = vector.multi_reduction <add>, %180, %cst_53 [1, 2] : vector<1x32x60xf32> to vector<1xf32>
    %182 = vector.shape_cast %181 : vector<1xf32> to vector<1x1x1xf32>
    %183 = vector.extract %182[0, 0, 0] : f32 from vector<1x1x1xf32>
    %cst_54 = arith.constant 0.000000e+00 : f32
    %184 = arith.addf %cst_54, %183 : f32
    %185 = arith.mulf %179, %179 : vector<32x60xf32>
    %186 = vector.shape_cast %185 : vector<32x60xf32> to vector<1x32x60xf32>
    %cst_55 = arith.constant dense<0.000000e+00> : vector<1xf32>
    %187 = vector.multi_reduction <add>, %186, %cst_55 [1, 2] : vector<1x32x60xf32> to vector<1xf32>
    %188 = vector.shape_cast %187 : vector<1xf32> to vector<1x1x1xf32>
    %189 = vector.extract %188[0, 0, 0] : f32 from vector<1x1x1xf32>
    %cst_56 = arith.constant 0.000000e+00 : f32
    %190 = arith.addf %cst_56, %189 : f32
    %cst_57 = arith.constant 1.920000e+03 : f32
    %191 = arith.divf %184, %cst_57 : f32
    %cst_58 = arith.constant 1.920000e+03 : f32
    %192 = arith.divf %190, %cst_58 : f32
    %193 = arith.mulf %191, %191 : f32
    %194 = arith.subf %192, %193 : f32
    %c0_59 = arith.constant 0 : index
    %c0_60 = arith.constant 0 : index
    %195 = vector.load %arg12[%c0_59, %c0_60] : memref<32x1xf32, #tpu.memory_space<vmem>>, vector<32x1xf32>
    %cst_61 = arith.constant 9.99999974E-6 : f32
    %196 = arith.addf %194, %cst_61 : f32
    %197 = math.rsqrt %196 : f32
    %198 = vector.broadcast %197 : f32 to vector<32x1xf32>
    %199 = arith.mulf %195, %198 : vector<32x1xf32>
    %c0_62 = arith.constant 0 : index
    %c0_63 = arith.constant 0 : index
    %200 = vector.load %arg13[%c0_62, %c0_63] : memref<32x1xf32, #tpu.memory_space<vmem>>, vector<32x1xf32>
    %201 = vector.broadcast %191 : f32 to vector<32x1xf32>
    %202 = arith.mulf %201, %199 : vector<32x1xf32>
    %203 = arith.subf %200, %202 : vector<32x1xf32>
    %204 = vector.broadcast %199 : vector<32x1xf32> to vector<32x60xf32>
    %205 = arith.mulf %179, %204 : vector<32x60xf32>
    %206 = vector.broadcast %203 : vector<32x1xf32> to vector<32x60xf32>
    %207 = arith.addf %205, %206 : vector<32x60xf32>
    %cst_64 = arith.constant 0.000000e+00 : f32
    %208 = vector.broadcast %cst_64 : f32 to vector<32x60xf32>
    %209 = arith.maximumf %207, %208 : vector<32x60xf32>
    %210 = arith.addf %209, %170 : vector<32x60xf32>
    %cst_65 = arith.constant 0.707106769 : f32
    %211 = vector.broadcast %cst_65 : f32 to vector<32x60xf32>
    %212 = arith.mulf %210, %211 : vector<32x60xf32>
    %213 = vector.extract_strided_slice %212 {offsets = [0, 0], sizes = [32, 1], strides = [1, 1]} : vector<32x60xf32> to vector<32x1xf32>
    %214 = tpu.concatenate %213, %213, %212 in 1 : vector<32x1xf32>, vector<32x1xf32>, vector<32x60xf32> -> vector<32x62xf32>
    %215 = vector.extract_strided_slice %214 {offsets = [0, 0], sizes = [32, 60], strides = [1, 1]} : vector<32x62xf32> to vector<32x60xf32>
    %216 = vector.extract_strided_slice %214 {offsets = [0, 1], sizes = [32, 60], strides = [1, 1]} : vector<32x62xf32> to vector<32x60xf32>
    %217 = vector.extract_strided_slice %214 {offsets = [0, 2], sizes = [32, 60], strides = [1, 1]} : vector<32x62xf32> to vector<32x60xf32>
    %218 = tpu.concatenate %215, %216, %217 in 0 : vector<32x60xf32>, vector<32x60xf32>, vector<32x60xf32> -> vector<96x60xf32>
    %219 = arith.truncf %218 : vector<96x60xf32> to vector<96x60xbf16>
    %c0_66 = arith.constant 0 : index
    %c0_67 = arith.constant 0 : index
    %220 = vector.load %arg14[%c0_66, %c0_67] : memref<32x96xbf16, #tpu.memory_space<vmem>>, vector<32x96xbf16>
    %cst_68 = arith.constant dense<0.000000e+00> : vector<32x60xf32>
    %221 = tpu.matmul %220, %219, %cst_68 {dimension_numbers = #tpu.dot_dimension_numbers<[1], [0], [0], [1], [0, 0, 1, 1], [], []>} : vector<32x96xbf16>, vector<96x60xbf16>, vector<32x60xf32> -> vector<32x60xf32>
    %222 = vector.shape_cast %221 : vector<32x60xf32> to vector<1x32x60xf32>
    %cst_69 = arith.constant dense<0.000000e+00> : vector<1xf32>
    %223 = vector.multi_reduction <add>, %222, %cst_69 [1, 2] : vector<1x32x60xf32> to vector<1xf32>
    %224 = vector.shape_cast %223 : vector<1xf32> to vector<1x1x1xf32>
    %225 = vector.extract %224[0, 0, 0] : f32 from vector<1x1x1xf32>
    %cst_70 = arith.constant 0.000000e+00 : f32
    %226 = arith.addf %cst_70, %225 : f32
    %227 = arith.mulf %221, %221 : vector<32x60xf32>
    %228 = vector.shape_cast %227 : vector<32x60xf32> to vector<1x32x60xf32>
    %cst_71 = arith.constant dense<0.000000e+00> : vector<1xf32>
    %229 = vector.multi_reduction <add>, %228, %cst_71 [1, 2] : vector<1x32x60xf32> to vector<1xf32>
    %230 = vector.shape_cast %229 : vector<1xf32> to vector<1x1x1xf32>
    %231 = vector.extract %230[0, 0, 0] : f32 from vector<1x1x1xf32>
    %cst_72 = arith.constant 0.000000e+00 : f32
    %232 = arith.addf %cst_72, %231 : f32
    %cst_73 = arith.constant 1.920000e+03 : f32
    %233 = arith.divf %226, %cst_73 : f32
    %cst_74 = arith.constant 1.920000e+03 : f32
    %234 = arith.divf %232, %cst_74 : f32
    %235 = arith.mulf %233, %233 : f32
    %236 = arith.subf %234, %235 : f32
    %c0_75 = arith.constant 0 : index
    %c0_76 = arith.constant 0 : index
    %237 = vector.load %arg15[%c0_75, %c0_76] : memref<32x1xf32, #tpu.memory_space<vmem>>, vector<32x1xf32>
    %cst_77 = arith.constant 9.99999974E-6 : f32
    %238 = arith.addf %236, %cst_77 : f32
    %239 = math.rsqrt %238 : f32
    %240 = vector.broadcast %239 : f32 to vector<32x1xf32>
    %241 = arith.mulf %237, %240 : vector<32x1xf32>
    %c0_78 = arith.constant 0 : index
    %c0_79 = arith.constant 0 : index
    %242 = vector.load %arg16[%c0_78, %c0_79] : memref<32x1xf32, #tpu.memory_space<vmem>>, vector<32x1xf32>
    %243 = vector.broadcast %233 : f32 to vector<32x1xf32>
    %244 = arith.mulf %243, %241 : vector<32x1xf32>
    %245 = arith.subf %242, %244 : vector<32x1xf32>
    %246 = vector.broadcast %241 : vector<32x1xf32> to vector<32x60xf32>
    %247 = arith.mulf %221, %246 : vector<32x60xf32>
    %248 = vector.broadcast %245 : vector<32x1xf32> to vector<32x60xf32>
    %249 = arith.addf %247, %248 : vector<32x60xf32>
    %cst_80 = arith.constant 0.000000e+00 : f32
    %250 = vector.broadcast %cst_80 : f32 to vector<32x60xf32>
    %251 = arith.maximumf %249, %250 : vector<32x60xf32>
    %252 = arith.addf %251, %212 : vector<32x60xf32>
    %cst_81 = arith.constant 0.707106769 : f32
    %253 = vector.broadcast %cst_81 : f32 to vector<32x60xf32>
    %254 = arith.mulf %252, %253 : vector<32x60xf32>
    %cst_82 = arith.constant 0.000000e+00 : f32
    %255 = vector.broadcast %cst_82 : f32 to vector<32x68xf32>
    %256 = tpu.concatenate %170, %255 in 1 : vector<32x60xf32>, vector<32x68xf32> -> vector<32x128xf32>
    %c0_83 = arith.constant 0 : index
    %c0_84 = arith.constant 0 : index
    %c0_85 = arith.constant 0 : index
    %257 = vector.load %arg17[%c0_83, %c0_84, %c0_85] : memref<1x32x128xf32, #tpu.memory_space<vmem>>, vector<1x32x128xf32>
    %258 = vector.shape_cast %257 : vector<1x32x128xf32> to vector<32x128xf32>
    %259 = vector.shape_cast %256 : vector<32x128xf32> to vector<1x32x128xf32>
    tpu.vector_store %arg17[%c0_83, %c0_84, %c0_85], %259 {strides = array<i32>} : memref<1x32x128xf32, #tpu.memory_space<vmem>>, vector<1x32x128xf32>,
    %cst_86 = arith.constant 0.000000e+00 : f32
    %260 = vector.broadcast %cst_86 : f32 to vector<32x68xf32>
    %261 = tpu.concatenate %254, %260 in 1 : vector<32x60xf32>, vector<32x68xf32> -> vector<32x128xf32>
    %c0_87 = arith.constant 0 : index
    %c0_88 = arith.constant 0 : index
    %c0_89 = arith.constant 0 : index
    %262 = vector.load %arg18[%c0_87, %c0_88, %c0_89] : memref<1x32x128xf32, #tpu.memory_space<vmem>>, vector<1x32x128xf32>
    %263 = vector.shape_cast %262 : vector<1x32x128xf32> to vector<32x128xf32>
    %264 = vector.shape_cast %261 : vector<32x128xf32> to vector<1x32x128xf32>
    tpu.vector_store %arg18[%c0_87, %c0_88, %c0_89], %264 {strides = array<i32>} : memref<1x32x128xf32, #tpu.memory_space<vmem>>, vector<1x32x128xf32>,
    return
  }
  func.func @transform_0(%arg0: i32) -> (i32, i32, i32) {
    %c0_i32 = arith.constant 0 : i32
    %c0_i32_0 = arith.constant 0 : i32
    %c0_i32_1 = arith.constant 0 : i32
    return %arg0, %c0_i32, %c0_i32_0 : i32, i32, i32
  }
  func.func @transform_1(%arg0: i32) -> (i32, i32) {
    %c0_i32 = arith.constant 0 : i32
    %c0_i32_0 = arith.constant 0 : i32
    %c0_i32_1 = arith.constant 0 : i32
    return %c0_i32, %c0_i32_0 : i32, i32
  }
  func.func @transform_2(%arg0: i32) -> (i32, i32) {
    %c0_i32 = arith.constant 0 : i32
    %c0_i32_0 = arith.constant 0 : i32
    %c0_i32_1 = arith.constant 0 : i32
    return %c0_i32, %c0_i32_0 : i32, i32
  }
  func.func @transform_3(%arg0: i32) -> (i32, i32) {
    %c0_i32 = arith.constant 0 : i32
    %c0_i32_0 = arith.constant 0 : i32
    %c0_i32_1 = arith.constant 0 : i32
    return %c0_i32, %c0_i32_0 : i32, i32
  }
  func.func @transform_4(%arg0: i32) -> (i32, i32) {
    %c0_i32 = arith.constant 0 : i32
    %c0_i32_0 = arith.constant 0 : i32
    %c0_i32_1 = arith.constant 0 : i32
    return %c0_i32, %c0_i32_0 : i32, i32
  }
  func.func @transform_5(%arg0: i32) -> (i32, i32) {
    %c0_i32 = arith.constant 0 : i32
    %c0_i32_0 = arith.constant 0 : i32
    %c0_i32_1 = arith.constant 0 : i32
    return %c0_i32, %c0_i32_0 : i32, i32
  }
  func.func @transform_6(%arg0: i32) -> (i32, i32) {
    %c0_i32 = arith.constant 0 : i32
    %c0_i32_0 = arith.constant 0 : i32
    %c0_i32_1 = arith.constant 0 : i32
    return %c0_i32, %c0_i32_0 : i32, i32
  }
  func.func @transform_7(%arg0: i32) -> (i32, i32) {
    %c0_i32 = arith.constant 0 : i32
    %c0_i32_0 = arith.constant 0 : i32
    %c0_i32_1 = arith.constant 0 : i32
    return %c0_i32, %c0_i32_0 : i32, i32
  }
  func.func @transform_8(%arg0: i32) -> (i32, i32) {
    %c0_i32 = arith.constant 0 : i32
    %c0_i32_0 = arith.constant 0 : i32
    %c0_i32_1 = arith.constant 0 : i32
    return %c0_i32, %c0_i32_0 : i32, i32
  }
  func.func @transform_9(%arg0: i32) -> (i32, i32) {
    %c0_i32 = arith.constant 0 : i32
    %c0_i32_0 = arith.constant 0 : i32
    %c0_i32_1 = arith.constant 0 : i32
    return %c0_i32, %c0_i32_0 : i32, i32
  }
  func.func @transform_10(%arg0: i32) -> (i32, i32) {
    %c0_i32 = arith.constant 0 : i32
    %c0_i32_0 = arith.constant 0 : i32
    %c0_i32_1 = arith.constant 0 : i32
    return %c0_i32, %c0_i32_0 : i32, i32
  }
  func.func @transform_11(%arg0: i32) -> (i32, i32) {
    %c0_i32 = arith.constant 0 : i32
    %c0_i32_0 = arith.constant 0 : i32
    %c0_i32_1 = arith.constant 0 : i32
    return %c0_i32, %c0_i32_0 : i32, i32
  }
  func.func @transform_12(%arg0: i32) -> (i32, i32) {
    %c0_i32 = arith.constant 0 : i32
    %c0_i32_0 = arith.constant 0 : i32
    %c0_i32_1 = arith.constant 0 : i32
    return %c0_i32, %c0_i32_0 : i32, i32
  }
  func.func @transform_13(%arg0: i32) -> (i32, i32) {
    %c0_i32 = arith.constant 0 : i32
    %c0_i32_0 = arith.constant 0 : i32
    %c0_i32_1 = arith.constant 0 : i32
    return %c0_i32, %c0_i32_0 : i32, i32
  }
  func.func @transform_14(%arg0: i32) -> (i32, i32) {
    %c0_i32 = arith.constant 0 : i32
    %c0_i32_0 = arith.constant 0 : i32
    %c0_i32_1 = arith.constant 0 : i32
    return %c0_i32, %c0_i32_0 : i32, i32
  }
  func.func @transform_15(%arg0: i32) -> (i32, i32) {
    %c0_i32 = arith.constant 0 : i32
    %c0_i32_0 = arith.constant 0 : i32
    %c0_i32_1 = arith.constant 0 : i32
    return %c0_i32, %c0_i32_0 : i32, i32
  }
  func.func @transform_16(%arg0: i32) -> (i32, i32, i32) {
    %c0_i32 = arith.constant 0 : i32
    %c0_i32_0 = arith.constant 0 : i32
    %c0_i32_1 = arith.constant 0 : i32
    return %arg0, %c0_i32, %c0_i32_0 : i32, i32, i32
  }
  func.func @transform_17(%arg0: i32) -> (i32, i32, i32) {
    %c0_i32 = arith.constant 0 : i32
    %c0_i32_0 = arith.constant 0 : i32
    %c0_i32_1 = arith.constant 0 : i32
    return %arg0, %c0_i32, %c0_i32_0 : i32, i32, i32
  }
}

</mosaic_0001>

<bundles_post_ra>
// kernel: wav2vec_forward.1
= control target key start
LH: loop header
LB: loop body
LE: loop exit
PB: predicated region body
PF: predicated region fallthrough
CT: control target
= control target key end

     0   :  { %s3236_s0 = inlined_call_operand.vmem [shape: f32[2,4,64], index: 0, kind: input, shape index: {}]   ;;  %s3237_s1 = inlined_call_operand.vmem [shape: f32[32,4], index: 1, kind: input, shape index: {}]   ;;  %s3238_s2 = inlined_call_operand.vmem [shape: f32[32,1], index: 2, kind: input, shape index: {}]   ;;  %s3239_s3 = inlined_call_operand.vmem [shape: f32[32,1], index: 3, kind: input, shape index: {}]   ;;  %s3240_s4 = inlined_call_operand.vmem [shape: bf16[32,128], index: 4, kind: input, shape index: {}]   ;;  %s3241_s5 = inlined_call_operand.vmem [shape: f32[32,1], index: 5, kind: input, shape index: {}]   ;;  %s3242_s6 = inlined_call_operand.vmem [shape: f32[32,1], index: 6, kind: input, shape index: {}]   ;;  %s3243_s7 = inlined_call_operand.vmem [shape: bf16[32,96], index: 7, kind: input, shape index: {}]   ;;  %s3244_s8 = inlined_call_operand.vmem [shape: f32[32,1], index: 8, kind: input, shape index: {}]   ;;  %s3245_s9 = inlined_call_operand.vmem [shape: f32[32,1], index: 9, kind: input, shape index: {}]   ;;  %s3246_s10 = inlined_call_operand.vmem [shape: bf16[32,96], index: 10, kind: input, shape index: {}]   ;;  %s3247_s11 = inlined_call_operand.vmem [shape: f32[32,1], index: 11, kind: input, shape index: {}]   ;;  %s3248_s12 = inlined_call_operand.vmem [shape: f32[32,1], index: 12, kind: input, shape index: {}]   ;;  %s3249_s13 = inlined_call_operand.vmem [shape: bf16[32,96], index: 13, kind: input, shape index: {}]   ;;  %s3250_s14 = inlined_call_operand.vmem [shape: f32[32,1], index: 14, kind: input, shape index: {}]   ;;  %s3251_s15 = inlined_call_operand.vmem [shape: f32[32,1], index: 15, kind: input, shape index: {}]   ;;  %s3252_s16 = inlined_call_operand.hbm [shape: f32[2,32,128], index: 16, kind: output, shape index: {0}]   ;;  %s3253_s17 = inlined_call_operand.hbm [shape: f32[2,32,128], index: 17, kind: output, shape index: {1}]  }
   0x1   :  { %3278 = sst [smem:[#allocation15_spill]] %s3236_s0 }
   0x2   :  { %3279 = sst [smem:[#allocation16_spill]] %s3237_s1 }
   0x3   :  { %3280 = sst [smem:[#allocation17_spill]] %s3252_s16 }
   0x4   :  { %3281 = sst [smem:[#allocation18_spill]] %s3253_s17 }
   0x5   :  { %23 = vsyncpa [#allocation3], 0 }
   0x6   :  { %25 = vsyncpa [#allocation3 + $0x1], 0 }
   0x7   :  { %26 = vsyncpa [#allocation5], 0 }
   0x8   :  { %28 = vsyncpa [#allocation5 + $0x1], 0  ;;  %s2628_s24 = smov 0   ;;  %s2630_s25 = smov 0  }
   0x9   :  { %s2632_s26 = smov 0   ;;  %s2634_s27 = smov 0  }
   0xa LB: > { %3282 = sst [smem:[#allocation8_spill]] %s2512_s24  ;;  %s2649_s28 = sadd.s32 4294967295, %s2524_s27   ;;  %s2524_s27 = sphi %s2634_s27, %s3307_s27   ;;  %s2520_s26 = sphi %s2632_s26, %s3309_s26   ;;  %s2516_s25 = sphi %s2630_s25, %s3311_s25   ;;  %s2512_s24 = sphi %s2628_s24, %s3310_s24  }
   0xb   : > { %3283 = sst [smem:[#allocation9_spill]] %s2520_s26  ;;  %s2065_s29 = sadd.s32 4294967294, %s2524_s27  }
   0xc   : > { %3284 = sst [smem:[#allocation10_spill]] %s2524_s27  ;;  %s2653_s0 = sadd.s32 1, %s2524_s27  }
   0xd   : > { %3285 = sst [smem:[#allocation11_spill]] %s2653_s0  ;;  %s382_s30 = sadd.s32 1, %s2520_s26 }
   0xe   : > { %s379_s18 = ssub.s32 %s2524_s27, %s2653_s0  ;;  %p392_p0 = scmp.ne.s32.totalorder %s2520_s26, %s2516_s25 }
   0xf   : > { %p380_p1 = scmp.eq.s32.totalorder %s379_s18, 0  ;;  %p393_p2 = scmp.eq.s32.totalorder %s2649_s28, 1 }
  0x10   : > { %p398_p3 = scmp.ne.s32.totalorder %s2516_s25, %s2512_s24  ;;  %p399_p4 = scmp.eq.s32.totalorder %s2065_s29, 1 }
  0x11   : > { %s2664_s19 = scalar_select %p380_p1, %s2520_s26, %s382_s30  }
  0x12   : > { %p2666_p5 = por %p393_p2, %p392_p0  ;;  %p2670_p6 = por %p399_p4, %p398_p3 }
  0x13   : > { %3286 = sst [smem:[#allocation12_spill]] %s2664_s19  ;;  %p2068_p7 = scmp.ge.s32.totalorder %s2524_s27, 1 }
  0x14   : > { %s3287_s1 = scalar_select %p2666_p5, 1, 0 }
  0x15   : > { %s3289_s20 = scalar_select %p2670_p6, 1, 0 }
  0x16   : > { %3288 = sst [smem:[#allocation13_spill]] %s3287_s1  ;;  %p495_p8 = scmp.lt.s32.totalorder %s2524_s27, 3 }
  0x17   : > { %3290 = sst [smem:[#allocation14_spill]] %s3289_s20 }
  0x18   : > { %p496_p9 = pnand %p2068_p7, %p495_p8 }
  0x19   : > { %s3291_s23 = sld [smem:[#allocation16_spill]] (!%p496_p9)  ;;  %p551_p10 = scmp.lt.s32.totalorder (!%p496_p9), %s2649_s28, 1 }
  0x1a   : > { %499 = sbr.rel (%p496_p9) target bundleno = 4052 (0xfd4), region = 84  ;;  %s3292_s29 = sld [smem:[#allocation15_spill]] (!%p496_p9) }
  0x1b   : > { %s3256_s21 = smov (!%p496_p9), 127  }
  0x1f   : > { %v559_v0 = vld [vmem:[%s3291_s23 + $0x10] sm:$0xff]  ;;  %v557_v1 = vld [vmem:[%s3291_s23] sm:$0xff]  ;;  %v2526_v2 = vmov 2   ;;  %v558_v3 = vld [vmem:[%s3291_s23 + $0x8] sm:$0xff]  ;;  %v2527_v4 = vmov 3   ;;  %v2528_v6 = vmov 0   ;;  %v581_v8 = vlaneseq }
  0x20   : > { %2287 = vset.pattern.permute.xlu1 %v2526_v2  ;;  %2286 = vset.pattern.permute.xlu0 %v2526_v2  ;;  %v560_v5 = vld [vmem:[%s3291_s23 + $0x18] sm:$0xff]  ;;  %v2529_v7 = vmov 1   ;;  %s552_s26 = scalar_select %p551_p10, %s2649_s28, 1  ;;  %vm741_vm0 = vcmask 523264   ;;  %vm780_vm1 = vcmask 515072   ;;  %vm1022_vm2 = vcmask 506880  }
  0x21   : > { %654 = vperm.xlu1 %2287, %v559_v0   ;;  %646 = vperm.xlu0 %2286, %v557_v1   ;;  %v582_v9 = vshrl.u32 %v581_v8, 7  ;;  %vm1195_vm3 = vcmask 785408   ;;  %vm1251_vm4 = vcmask 490496   ;;  %vm1404_vm5 = vcmask 7168  }
  0x22   : > { %s2071_s19 = sshll.u32 %s552_s26, 2  ;;  %vm1409_vm6 = vcmask 15360  }
  0x23   : > { %s554_s30 = scalar_lea.vmem %s3292_s29, %s2071_s19  ;;  %v583_v10 = vsub.s32 0, %v582_v9  ;;  %v623_v16 = vsub.s32 1, %v582_v9  ;;  %v595_v26 = vsub.s32 2, %v582_v9  ;;  %v635_v35 = vsub.s32 3, %v582_v9 }
  0x24   : > { %v556_v11 = vld [vmem:[%s554_s30] sm:$0xf] }
  0x25   : > { %2288 = vset.pattern.permute.xlu1 %v2527_v4  ;;  %650 = vperm.xlu0 %2286, %v558_v3   ;;  %v584_v12 = vrot.slane %v556_v11, %v583_v10  ;;  %v624_v21 = vrot.slane %v556_v11, %v623_v16  ;;  %v596_v31 = vrot.slane %v556_v11, %v595_v26 }
  0x26   : > { %694 = vperm.xlu1 %2288, %v557_v1   ;;  %v636_v40 = vrot.slane %v556_v11, %v635_v35 }
  0x29   : > { %2289 = vset.pattern.permute.xlu0 %v2527_v4 }
  0x2a   : > { %2290 = vset.pattern.permute.xlu1 %v2526_v2  ;;  %698 = vperm.xlu0 %2289, %v558_v3  }
  0x2b   : > { %658 = vperm.xlu1 %2290, %v560_v5  }
  0x2e   : > { %706 = vperm.xlu0 %2289, %v560_v5  }
  0x2f   : > { %2291 = vset.pattern.permute.xlu1 %v2527_v4 }
  0x30   : > { %702 = vperm.xlu1 %2291, %v559_v0  }
  0x32   : > { %2293 = vset.pattern.permute.xlu0 %v2528_v6 }
  0x33   : > { %568 = vperm.xlu0 %2293, %v558_v3  }
  0x34   : > { %2292 = vset.pattern.permute.xlu1 %v2528_v6 }
  0x35   : > { %563 = vperm.xlu1 %2292, %v557_v1  }
  0x37   : > { %573 = vperm.xlu0 %2293, %v559_v0  }
  0x39   : > { %2294 = vset.pattern.permute.xlu1 %v2529_v7 }
  0x3a   : > { %606 = vperm.xlu1 %2294, %v557_v1  }
  0x3b   : > { %578 = vperm.xlu0 %2293, %v560_v5  }
  0x3e   : > { %610 = vperm.xlu1 %2294, %v558_v3  }
  0x42   : > { %614 = vperm.xlu1 %2294, %v559_v0  }
  0x46   : > { %618 = vperm.xlu1 %2294, %v560_v5  }
  0x4a   : > { %2295 = vset.pattern.permute.xlu1 %v2528_v6 }
  0x9c   : > { %v655_v13 = vpop.permute.xlu1 %654  ;;  %v647_v14 = vpop.permute.xlu0 %646 }
  0x9d   : > { %v669_v15 = vmul.f32 %v647_v14, %v584_v12  ;;  %v671_v18 = vmul.f32 %v655_v13, %v584_v12  ;;  %v661_v51 = vmul.f32 %v647_v14, %v596_v31  ;;  %v663_v63 = vmul.f32 %v655_v13, %v596_v31 }
  0x9f   : > { %677 = vrot.lane.b32.xlu0 %v669_v15, %s3256_s21 }
  0xa0   : > { %v651_v17 = vpop.permute.xlu0 %650 }
  0xa1   : > { %v670_v19 = vmul.f32 %v651_v17, %v584_v12  ;;  %v695_v20 = vpop.permute.xlu1 %694  ;;  %v662_v52 = vmul.f32 %v651_v17, %v596_v31 }
  0xa2   : > { %v717_v22 = vmul.f32 %v695_v20, %v624_v21  ;;  %v709_v0 = vmul.f32 %v695_v20, %v636_v40 }
  0xa3   : > { %679 = vrot.lane.b32.xlu1 %v670_v19, %s3256_s21  ;;  %681 = vrot.lane.b32.xlu0 %v671_v18, %s3256_s21 }
  0xa5   : > { %v699_v23 = vpop.permute.xlu0 %698 }
  0xa6   : > { %v718_v24 = vmul.f32 %v699_v23, %v624_v21  ;;  %v659_v25 = vpop.permute.xlu1 %658  ;;  %v710_v57 = vmul.f32 %v699_v23, %v636_v40 }
  0xa7   : > { %725 = vrot.lane.b32.xlu1 %v717_v22, %s3256_s21  ;;  %v672_v27 = vmul.f32 %v659_v25, %v584_v12  ;;  %v664_v14 = vmul.f32 %v659_v25, %v596_v31 }
  0xa8   : > { %727 = vrot.lane.b32.xlu0 %v718_v24, %s3256_s21 }
  0xa9   : > { %v707_v28 = vpop.permute.xlu0 %706 }
  0xaa   : > { %v720_v32 = vmul.f32 %v707_v28, %v624_v21  ;;  %v712_v17 = vmul.f32 %v707_v28, %v636_v40 }
  0xab   : > { %v703_v29 = vpop.permute.xlu1 %702  ;;  %683 = vrot.lane.b32.xlu1 %v672_v27, %s3256_s21 }
  0xac   : > { %v719_v30 = vmul.f32 %v703_v29, %v624_v21  ;;  %v711_v6 = vmul.f32 %v703_v29, %v636_v40 }
  0xae   : > { %729 = vrot.lane.b32.xlu0 %v719_v30, %s3256_s21  ;;  %v569_v33 = vpop.permute.xlu0 %568 }
  0xaf   : > { %731 = vrot.lane.b32.xlu1 %v720_v32, %s3256_s21  ;;  %v598_v34 = vmul.f32 %v596_v31, %v569_v33  ;;  %v586_v45 = vmul.f32 %v584_v12, %v569_v33 }
  0xb0   : > { %v564_v36 = vpop.permute.xlu1 %563 }
  0xb1   : > { %v597_v37 = vmul.f32 %v596_v31, %v564_v36  ;;  %v585_v42 = vmul.f32 %v584_v12, %v564_v36 }
  0xb2   : > { %v574_v38 = vpop.permute.xlu0 %573 }
  0xb3   : > { %v599_v39 = vmul.f32 %v596_v31, %v574_v38  ;;  %v587_v54 = vmul.f32 %v584_v12, %v574_v38 }
  0xb5   : > { %v607_v41 = vpop.permute.xlu1 %606 }
  0xb6   : > { %v625_v43 = vmul.f32 %v624_v21, %v607_v41  ;;  %v637_v44 = vmul.f32 %v636_v40, %v607_v41  ;;  %v579_v55 = vpop.permute.xlu0 %578 }
  0xb7   : > { %v588_v1 = vmul.f32 %v584_v12, %v579_v55  ;;  %v600_v4 = vmul.f32 %v596_v31, %v579_v55 }
  0xb8   : > { %v641_v46 = vadd.f32 %v637_v44, %v597_v37  ;;  %v629_v48 = vadd.f32 %v625_v43, %v585_v42 }
  0xb9   : > { %v611_v47 = vpop.permute.xlu1 %610 }
  0xba   : > { %v626_v49 = vmul.f32 %v624_v21, %v611_v47  ;;  %v638_v50 = vmul.f32 %v636_v40, %v611_v47  ;;  %v665_v59 = vadd.f32 %v661_v51, %v629_v48 }
  0xbc   : > { %v630_v53 = vadd.f32 %v626_v49, %v586_v45  ;;  %v642_v56 = vadd.f32 %v638_v50, %v598_v34  ;;  %v2703_v8 = vadd.f32 %v709_v0, %v665_v59 }
  0xbd   : > { %v615_v58 = vpop.permute.xlu1 %614 }
  0xbe   : > { %v666_v60 = vadd.f32 %v662_v52, %v630_v53  ;;  %v627_v61 = vmul.f32 %v624_v21, %v615_v58  ;;  %v639_v62 = vmul.f32 %v636_v40, %v615_v58  ;;  %v742_v19 = vsel %vm741_vm0, %v2703_v8, 0.0 }
  0xbf   : > { %v759_v24 = vmul.f32 %v2703_v8, %v2703_v8 }
  0xc0   : > { %v2701_v2 = vadd.f32 %v710_v57, %v666_v60  ;;  %v631_v3 = vadd.f32 %v627_v61, %v587_v54  ;;  %v643_v5 = vadd.f32 %v639_v62, %v599_v39 }
  0xc1   : > { %v619_v7 = vpop.permute.xlu1 %618  ;;  %v763_v31 = vsel %vm741_vm0, %v759_v24, 0.0 }
  0xc2   : > { %v667_v9 = vadd.f32 %v663_v63, %v631_v3  ;;  %v628_v10 = vmul.f32 %v624_v21, %v619_v7  ;;  %v640_v11 = vmul.f32 %v636_v40, %v619_v7  ;;  %v743_v12 = vsel %vm741_vm0, %v2701_v2, 0.0 }
  0xc3   : > { %v760_v21 = vmul.f32 %v2701_v2, %v2701_v2  ;;  %v744_v22 = vadd.f32 %v743_v12, %v742_v19 }
  0xc4   : > { %v2705_v15 = vadd.f32 %v711_v6, %v667_v9  ;;  %v632_v16 = vadd.f32 %v628_v10, %v588_v1  ;;  %v644_v13 = vadd.f32 %v640_v11, %v600_v4 }
  0xc5   : > { %v764_v29 = vsel %vm741_vm0, %v760_v21, 0.0 }
  0xc6   : > { %v668_v18 = vadd.f32 %v664_v14, %v632_v16  ;;  %v745_v20 = vsel %vm741_vm0, %v2705_v15, 0.0  ;;  %v761_v25 = vmul.f32 %v2705_v15, %v2705_v15  ;;  %v765_v33 = vadd.f32 %v764_v29, %v763_v31 }
  0xc7   : > { %v746_v26 = vadd.f32 %v745_v20, %v744_v22 }
  0xc8   : > { %v2715_v23 = vadd.f32 %v712_v17, %v668_v18  ;;  %v766_v32 = vsel %vm741_vm0, %v761_v25, 0.0 }
  0xc9   : > { %v767_v35 = vadd.f32 %v766_v32, %v765_v33 }
  0xca   : > { %v747_v27 = vsel %vm741_vm0, %v2715_v23, 0.0  ;;  %v762_v28 = vmul.f32 %v2715_v23, %v2715_v23 }
  0xcb   : > { %v748_v30 = vadd.f32 %v747_v27, %v746_v26 }
  0xcc   : > { %v768_v34 = vsel %vm741_vm0, %v762_v28, 0.0 }
  0xcd   : > { %749 = vadd.xlane.f32.xlu0 %v748_v30  ;;  %v769_v36 = vadd.f32 %v768_v34, %v767_v35 }
  0xd3   : > { %770 = vadd.xlane.f32.xlu1 %v769_v36 }
 0x111   : > { %v678_v37 = vpop.permute.xlu0 %677 }
 0x112   : > { %v689_v40 = vadd.f32 %v678_v37, %v641_v46 }
 0x115   : > { %v680_v38 = vpop.permute.xlu1 %679  ;;  %v682_v39 = vpop.permute.xlu0 %681 }
 0x116   : > { %v690_v41 = vadd.f32 %v680_v38, %v642_v56  ;;  %v691_v50 = vadd.f32 %v682_v39, %v643_v5 }
 0x119   : > { %v726_v42 = vpop.permute.xlu1 %725 }
 0x11a   : > { %v2729_v43 = vadd.f32 %v726_v42, %v689_v40  ;;  %v728_v44 = vpop.permute.xlu0 %727  ;;  %v829_v42 = vld [vmem:[%s3238_s2 + $0x10] sm:$0xff] }
 0x11b   : > { %v2731_v45 = vadd.f32 %v728_v44, %v690_v41  ;;  %v830_v41 = vld [vmem:[%s3238_s2 + $0x18] sm:$0xff]  ;;  %v827_v44 = vld [vmem:[%s3238_s2] sm:$0xff] }
 0x11c   : > { %v798_v47 = vmul.f32 %v2729_v43, %v2729_v43  ;;  %v781_v51 = vsel %vm780_vm1, %v2729_v43, 0.0 }
 0x11d   : > { %v799_v48 = vmul.f32 %v2731_v45, %v2731_v45  ;;  %v684_v49 = vpop.permute.xlu1 %683  ;;  %v782_v46 = vsel %vm780_vm1, %v2731_v45, 0.0 }
 0x11e   : > { %v692_v52 = vadd.f32 %v684_v49, %v644_v13  ;;  %v802_v56 = vsel %vm780_vm1, %v798_v47, 0.0  ;;  %v783_v59 = vadd.f32 %v782_v46, %v781_v51  ;;  %v828_v51 = vld [vmem:[%s3238_s2 + $0x8] sm:$0xff] }
 0x11f   : > { %v803_v57 = vsel %vm780_vm1, %v799_v48, 0.0 }
 0x120   : > { %v730_v53 = vpop.permute.xlu0 %729  ;;  %v804_v1 = vadd.f32 %v803_v57, %v802_v56  ;;  %v842_v56 = vld [vmem:[%s3239_s3 + $0x10] sm:$0xff]  ;;  %v840_v57 = vld [vmem:[%s3239_s3] sm:$0xff] }
 0x121   : > { %v2741_v54 = vadd.f32 %v730_v53, %v691_v50  ;;  %v732_v55 = vpop.permute.xlu1 %731 }
 0x122   : > { %v2745_v58 = vadd.f32 %v732_v55, %v692_v52 }
 0x123   : > { %v800_v60 = vmul.f32 %v2741_v54, %v2741_v54  ;;  %v784_v61 = vsel %vm780_vm1, %v2741_v54, 0.0 }
 0x124   : > { %v785_v62 = vadd.f32 %v784_v61, %v783_v59  ;;  %v786_v63 = vsel %vm780_vm1, %v2745_v58, 0.0  ;;  %v801_v0 = vmul.f32 %v2745_v58, %v2745_v58 }
 0x125   : > { %v805_v3 = vsel %vm780_vm1, %v800_v60, 0.0 }
 0x126   : > { %v787_v4 = vadd.f32 %v786_v63, %v785_v62  ;;  %v806_v5 = vadd.f32 %v805_v3, %v804_v1  ;;  %v807_v6 = vsel %vm780_vm1, %v801_v0, 0.0  ;;  %v843_v62 = vld [vmem:[%s3239_s3 + $0x18] sm:$0xff]  ;;  %v841_v1 = vld [vmem:[%s3239_s3 + $0x8] sm:$0xff] }
 0x128   : > { %788 = vadd.xlane.f32.xlu0 %v787_v4  ;;  %v808_v7 = vadd.f32 %v807_v6, %v806_v5 }
 0x12c   : > { %809 = vadd.xlane.f32.xlu0 %v808_v7 }
 0x156   : > { %v750_v9 = vpop.xlane.xlu0 %749 }
 0x157   : > { %v751_v10 = vrot.slane %v750_v9, 4 }
 0x159   : > { %v752_v11 = vadd.f32 %v751_v10, %v750_v9 }
 0x15b   : > { %v753_v14 = vrot.slane %v752_v11, 2 }
 0x15c   : > { %v771_v16 = vpop.xlane.xlu1 %770 }
 0x15d   : > { %v772_v12 = vrot.slane %v771_v16, 4  ;;  %v754_v13 = vadd.f32 %v753_v14, %v752_v11 }
 0x15f   : > { %v773_v17 = vadd.f32 %v772_v12, %v771_v16  ;;  %v755_v18 = vrot.slane %v754_v13, 1 }
 0x161   : > { %v774_v19 = vrot.slane %v773_v17, 2  ;;  %v756_v20 = vadd.f32 %v755_v18, %v754_v13 }
 0x163   : > { %2198 = vpush %v756_v20  ;;  %v775_v21 = vadd.f32 %v774_v19, %v773_v17 }
 0x165   : > { %v776_v22 = vrot.slane %v775_v21, 1 }
 0x167   : > { %v777_v24 = vadd.f32 %v776_v22, %v775_v21 }
 0x169   : > { %2200 = vpush %v777_v24 }
 0x194   : > { %s2199_s26 = spop %2198 }
 0x19a   : > { %s2201_s19 = spop %2200 }
 0x1b1   : > { %v789_v25 = vpop.xlane.xlu0 %788 }
 0x1b2   : > { %v790_v26 = vrot.slane %v789_v25, 4 }
 0x1b4   : > { %v791_v27 = vadd.f32 %v790_v26, %v789_v25 }
 0x1b5   : > { %v810_v28 = vpop.xlane.xlu0 %809 }
 0x1b6   : > { %v792_v29 = vrot.slane %v791_v27, 2  ;;  %v811_v30 = vrot.slane %v810_v28, 4 }
 0x1b8   : > { %v812_v31 = vadd.f32 %v811_v30, %v810_v28  ;;  %v793_v32 = vadd.f32 %v792_v29, %v791_v27 }
 0x1ba   : > { %v813_v33 = vrot.slane %v812_v31, 2  ;;  %v794_v34 = vrot.slane %v793_v32, 1 }
 0x1bc   : > { %v795_v35 = vadd.f32 %v794_v34, %v793_v32  ;;  %v814_v36 = vadd.f32 %v813_v33, %v812_v31 }
 0x1be   : > { %2202 = vpush %v795_v35  ;;  %v815_v37 = vrot.slane %v814_v36, 1 }
 0x1c0   : > { %v816_v38 = vadd.f32 %v815_v37, %v814_v36 }
 0x1c2   : > { %2204 = vpush %v816_v38 }
 0x1ef   : > { %s2203_s22 = spop %2202 }
 0x1f0   : > { %s797_s18 = sadd.f32 %s2203_s22, %s2199_s26 }
 0x1f2   : > { %s821_s29 = smul.f32 0.000246063, %s797_s18 }
 0x1f3   : > { %s2205_s30 = spop %2204 }
 0x1f4   : > { %s818_s21 = sadd.f32 %s2205_s30, %s2201_s19  ;;  %s825_s23 = smul.f32 %s821_s29, %s821_s29  ;;  %v844_v46 = vstv %s821_s29 }
 0x1f5   : > { %s3293_s29 = smov 127   ;;  %s3269_s30 = smov 126  }
 0x1f6   : > { %s824_s0 = smul.f32 0.000246063, %s818_s21 }
 0x1f8   : > { %s826_s20 = ssub.f32 %s824_s0, %s825_s23 }
 0x1fa   : > { %s831_s24 = sadd.f32 1e-05, %s826_s20 }
 0x1fc   : > { %v832_v39 = vstv %s831_s24 }
 0x1fd   : > { %2424 = vrsqrt.f32 %v832_v39  ;;  %v2416_v39 = vld [vmem:[%s3240_s4] sm:$0xff]  }
 0x1fe   : > { %2146 = vmatprep.mubr.bf16.mxu0 %v2416_v39 }
 0x20a   : > { %v2425_v40 = vpop.eup %2424 }
 0x20b   : > { %2206 = vpush %v2425_v40 }
 0x23c   : > { %s2207_s19 = spop %2206 }
 0x23d   : > { %v835_v47 = vstv %s2207_s19 }
 0x23e   : > { %v839_v48 = vmul.f32 %v835_v47, %v830_v41  ;;  %v838_v49 = vmul.f32 %v835_v47, %v829_v42  ;;  %v836_v50 = vmul.f32 %v835_v47, %v827_v44  ;;  %v837_v52 = vmul.f32 %v835_v47, %v828_v51 }
 0x240   : > { %870 = vperm.xlu0 %2293, %v839_v48   ;;  %865 = vperm.xlu1 %2295, %v838_v49   ;;  %v847_v53 = vmul.f32 %v844_v46, %v838_v49  ;;  %v845_v55 = vmul.f32 %v844_v46, %v836_v50  ;;  %v848_v61 = vmul.f32 %v844_v46, %v839_v48 }
 0x241   : > { %v846_v0 = vmul.f32 %v844_v46, %v837_v52 }
 0x242   : > { %v851_v59 = vsub.f32 %v842_v56, %v847_v53  ;;  %v849_v60 = vsub.f32 %v840_v57, %v845_v55  ;;  %v852_v63 = vsub.f32 %v843_v62, %v848_v61 }
 0x243   : > { %v850_v3 = vsub.f32 %v841_v1, %v846_v0 }
 0x244   : > { %860 = vperm.xlu1 %2295, %v837_v52   ;;  %855 = vperm.xlu0 %2293, %v836_v50  }
 0x248   : > { %889 = vperm.xlu1 %2295, %v851_v59   ;;  %879 = vperm.xlu0 %2293, %v849_v60   ;;  %v2417_v60 = vld [vmem:[%s3240_s4 + $0x8] sm:$0xff]  }
 0x24c   : > { %894 = vperm.xlu1 %2295, %v852_v63  }
 0x250   : > { %884 = vperm.xlu1 %2295, %v850_v3  }
 0x2bb   : > { %v871_v4 = vpop.permute.xlu0 %870  ;;  %v866_v5 = vpop.permute.xlu1 %865 }
 0x2bc   : > { %v907_v10 = vmul.f32 %v866_v5, %v2741_v54  ;;  %v875_v11 = vmul.f32 %v866_v5, %v2705_v15  ;;  %v876_v14 = vmul.f32 %v871_v4, %v2715_v23  ;;  %v908_v16 = vmul.f32 %v871_v4, %v2745_v58 }
 0x2bf   : > { %v861_v6 = vpop.permute.xlu1 %860  ;;  %v856_v7 = vpop.permute.xlu0 %855 }
 0x2c0   : > { %v873_v17 = vmul.f32 %v856_v7, %v2703_v8  ;;  %v905_v20 = vmul.f32 %v856_v7, %v2729_v43  ;;  %v874_v24 = vmul.f32 %v861_v6, %v2701_v2  ;;  %v906_v54 = vmul.f32 %v861_v6, %v2731_v45 }
 0x2c3   : > { %v890_v9 = vpop.permute.xlu1 %889  ;;  %v880_v13 = vpop.permute.xlu0 %879 }
 0x2c4   : > { %v911_v12 = vadd.f32 %v907_v10, %v890_v9  ;;  %v899_v18 = vadd.f32 %v890_v9, %v875_v11  ;;  %v897_v25 = vadd.f32 %v880_v13, %v873_v17  ;;  %v909_v26 = vadd.f32 %v905_v20, %v880_v13 }
 0x2c6   : > { %v915_v15 = vmax.f32 %v911_v12, 0.0  ;;  %v903_v58 = vmax.f32 %v899_v18, 0.0  ;;  %v901_v33 = vmax.f32 %v897_v25, 0.0  ;;  %v913_v43 = vmax.f32 %v909_v26, 0.0 }
 0x2c7   : > { %v895_v19 = vpop.permute.xlu1 %894 }
 0x2c8   : > { %v900_v21 = vadd.f32 %v895_v19, %v876_v14  ;;  %v912_v22 = vadd.f32 %v908_v16, %v895_v19 }
 0x2ca   : > { %v904_v23 = vmax.f32 %v900_v21, 0.0  ;;  %v916_v27 = vmax.f32 %v912_v22, 0.0 }
 0x2cb   : > { %v885_v28 = vpop.permute.xlu1 %884 }
 0x2cc   : > { %v898_v29 = vadd.f32 %v885_v28, %v874_v24  ;;  %v910_v30 = vadd.f32 %v906_v54, %v885_v28  ;;  %v2296_v8 = vpack.i.bf16 %v916_v27, %v915_v15  ;;  %v952_v31 = vpack.c.bf16 %v916_v27, %v915_v15 }
 0x2cd   : > { %v950_v32 = vpack.c.bf16 %v904_v23, %v903_v58  ;;  %v2306_v2 = vpack.i.bf16 %v904_v23, %v903_v58 }
 0x2ce   : > { %v902_v34 = vmax.f32 %v898_v29, 0.0  ;;  %v914_v35 = vmax.f32 %v910_v30, 0.0  ;;  %2297 = vrot.lane.b32.xlu0 %v2296_v8, %s3293_s29 }
 0x2d0   : > { %v2301_v45 = vpack.i.bf16 %v914_v35, %v913_v43  ;;  %v951_v36 = vpack.c.bf16 %v914_v35, %v913_v43  ;;  %v949_v37 = vpack.c.bf16 %v902_v34, %v901_v33  ;;  %v2311_v38 = vpack.i.bf16 %v902_v34, %v901_v33  ;;  %v1072_v43 = vld [vmem:[%s3241_s5 + $0x18] sm:$0xff]  ;;  %v1071_v34 = vld [vmem:[%s3241_s5 + $0x10] sm:$0xff] }
 0x2d2   : > { %2307 = vrot.lane.b32.xlu0 %v2306_v2, %s3293_s29  ;;  %2302 = vrot.lane.b32.xlu1 %v2301_v45, %s3293_s29 }
 0x2d6   : > { %2312 = vrot.lane.b32.xlu1 %v2311_v38, %s3293_s29 }
 0x340   : > { %v2298_v40 = vpop.permute.xlu0 %2297 }
 0x341   : > { %v2300_v41 = vunpack.i.h.bf16 %v2298_v40  ;;  %v2299_v42 = vunpack.i.l.bf16 %v2298_v40 }
 0x343   : > { %v956_v44 = vpack.c.bf16 %v2300_v41, %v2299_v42 }
 0x344   : > { %v2303_v47 = vpop.permute.xlu1 %2302  ;;  %v2308_v48 = vpop.permute.xlu0 %2307 }
 0x345   : > { %v2305_v49 = vunpack.i.h.bf16 %v2303_v47  ;;  %v2304_v50 = vunpack.i.l.bf16 %v2303_v47  ;;  %v2310_v51 = vunpack.i.h.bf16 %v2308_v48  ;;  %v2309_v46 = vunpack.i.l.bf16 %v2308_v48  ;;  %2130 = vmatprep.subr.bf16.mxu0 %v956_v44  ;;  %v1084_v47 = vld [vmem:[%s3242_s6 + $0x10] sm:$0xff] }
 0x346   : > { %2131 = vmatpush3.bf16.msra.mxu0 %v956_v44  ;;  %v1085_v44 = vld [vmem:[%s3242_s6 + $0x18] sm:$0xff] }
 0x347   : > { %v955_v52 = vpack.c.bf16 %v2305_v49, %v2304_v50  ;;  %v954_v55 = vpack.c.bf16 %v2310_v51, %v2309_v46  ;;  %v1083_v46 = vld [vmem:[%s3242_s6 + $0x8] sm:$0xff] }
 0x348   : > { %v2313_v53 = vpop.permute.xlu1 %2312 }
 0x349   : > { %v2315_v56 = vunpack.i.h.bf16 %v2313_v53  ;;  %v2314_v57 = vunpack.i.l.bf16 %v2313_v53  ;;  %2132 = vmatprep.subr.bf16.mxu0 %v955_v52 }
 0x34a   : > { %2133 = vmatpush3.bf16.msra.mxu0 %v955_v52  ;;  %v1082_v52 = vld [vmem:[%s3242_s6] sm:$0xff] }
 0x34b   : > { %2134 = vmatprep.subr.bf16.mxu0 %v954_v55  ;;  %v953_v59 = vpack.c.bf16 %v2315_v56, %v2314_v57 }
 0x34e   : > { %2135 = vmatpush3.bf16.msra.mxu0 %v954_v55 }
 0x34f   : > { %2136 = vmatprep.subr.bf16.mxu0 %v953_v59 }
 0x352   : > { %2137 = vmatpush3.bf16.msra.mxu0 %v953_v59 }
 0x353   : > { %2138 = vmatprep.subr.bf16.mxu0 %v952_v31 }
 0x356   : > { %2139 = vmatpush3.bf16.msra.mxu0 %v952_v31 }
 0x357   : > { %2140 = vmatprep.subr.bf16.mxu0 %v951_v36 }
 0x35a   : > { %2141 = vmatpush3.bf16.msra.mxu0 %v951_v36  ;;  %v1070_v36 = vld [vmem:[%s3241_s5 + $0x8] sm:$0xff] }
 0x35b   : > { %2142 = vmatprep.subr.bf16.mxu0 %v950_v32 }
 0x35e   : > { %2143 = vmatpush3.bf16.msra.mxu0 %v950_v32 }
 0x35f   : > { %2144 = vmatprep.subr.bf16.mxu0 %v949_v37 }
 0x362   : > { %2145 = vmatpush3.bf16.msra.mxu0 %v949_v37  ;;  %v1069_v37 = vld [vmem:[%s3241_s5] sm:$0xff] }
 0x365   : > { %2147 = vmatmul.mubr.bf16.vlgmr.msra.gmra.mxu0 %v2417_v60 }
 0x425   : > { %v2799_v61 = vpop.f32.mrf.mxu0 }
 0x426   : > { %v1042_v3 = vmul.f32 %v2799_v61, %v2799_v61  ;;  %v1026_v9 = vsel %vm1022_vm2, %v2799_v61, 0.0 }
 0x427   : > { %v2801_v62 = vpop.f32.mrf.mxu0 }
 0x428   : > { %v1040_v0 = vmul.f32 %v2801_v62, %v2801_v62  ;;  %v1023_v4 = vsel %vm1022_vm2, %v2801_v62, 0.0  ;;  %v1047_v17 = vsel %vm1022_vm2, %v1042_v3, 0.0 }
 0x429   : > { %v2803_v63 = vpop.f32.mrf.mxu0 }
 0x42a   : > { %v1044_v10 = vsel %vm1022_vm2, %v1040_v0, 0.0  ;;  %v1043_v11 = vmul.f32 %v2803_v63, %v2803_v63  ;;  %v1028_v13 = vsel %vm1022_vm2, %v2803_v63, 0.0 }
 0x42b   : > { %v2807_v1 = vpop.f32.mrf.mxu0 }
 0x42c   : > { %v1024_v5 = vsel %vm1022_vm2, %v2807_v1, 0.0  ;;  %v1041_v6 = vmul.f32 %v2807_v1, %v2807_v1  ;;  %v1049_v20 = vsel %vm1022_vm2, %v1043_v11, 0.0 }
 0x42d   : > { %v1025_v7 = vadd.f32 %v1024_v5, %v1023_v4 }
 0x42e   : > { %v1045_v14 = vsel %vm1022_vm2, %v1041_v6, 0.0 }
 0x42f   : > { %v1027_v16 = vadd.f32 %v1026_v9, %v1025_v7  ;;  %v1046_v12 = vadd.f32 %v1045_v14, %v1044_v10 }
 0x431   : > { %v1029_v18 = vadd.f32 %v1028_v13, %v1027_v16  ;;  %v1048_v19 = vadd.f32 %v1047_v17, %v1046_v12 }
 0x433   : > { %1030 = vadd.xlane.f32.xlu0 %v1029_v18  ;;  %v1050_v21 = vadd.f32 %v1049_v20, %v1048_v19 }
 0x435   : > { %1051 = vadd.xlane.f32.xlu1 %v1050_v21 }
 0x4bc   : > { %v1031_v22 = vpop.xlane.xlu0 %1030 }
 0x4bd   : > { %v1032_v24 = vrot.slane %v1031_v22, 4 }
 0x4be   : > { %v1052_v54 = vpop.xlane.xlu1 %1051 }
 0x4bf   : > { %v1033_v25 = vadd.f32 %v1032_v24, %v1031_v22  ;;  %v1053_v15 = vrot.slane %v1052_v54, 4 }
 0x4c1   : > { %v1034_v26 = vrot.slane %v1033_v25, 2  ;;  %v1054_v23 = vadd.f32 %v1053_v15, %v1052_v54 }
 0x4c3   : > { %v1055_v27 = vrot.slane %v1054_v23, 2  ;;  %v1035_v58 = vadd.f32 %v1034_v26, %v1033_v25 }
 0x4c5   : > { %v1036_v28 = vrot.slane %v1035_v58, 1  ;;  %v1056_v29 = vadd.f32 %v1055_v27, %v1054_v23 }
 0x4c7   : > { %v1037_v30 = vadd.f32 %v1036_v28, %v1035_v58  ;;  %v1057_v8 = vrot.slane %v1056_v29, 1 }
 0x4c9   : > { %2208 = vpush %v1037_v30  ;;  %v1058_v31 = vadd.f32 %v1057_v8, %v1056_v29 }
 0x4cb   : > { %2210 = vpush %v1058_v31 }
 0x4fa   : > { %s2209_s24 = spop %2208 }
 0x4fb   : > { %s1063_s0 = smul.f32 0.00050403224, %s2209_s24 }
 0x4fc   : > { %s2211_s16 = spop %2210 }
 0x4fd   : > { %s1067_s17 = smul.f32 %s1063_s0, %s1063_s0  ;;  %v1086_v38 = vstv %s1063_s0 }
 0x4fe   : > { %s1066_s27 = smul.f32 0.00050403224, %s2211_s16 }
 0x500   : > { %s1068_s1 = ssub.f32 %s1066_s27, %s1067_s17 }
 0x502   : > { %s1073_s20 = sadd.f32 1e-05, %s1068_s1 }
 0x504   : > { %v1074_v32 = vstv %s1073_s20 }
 0x505   : > { %2426 = vrsqrt.f32 %v1074_v32 }
 0x512   : > { %v2427_v33 = vpop.eup %2426 }
 0x513   : > { %2212 = vpush %v2427_v33  ;;  %v2419_v33 = vld [vmem:[%s3243_s7 + $0x8] sm:$0xff]  }
 0x544   : > { %s2213_s26 = spop %2212 }
 0x545   : > { %v1077_v35 = vstv %s2213_s26 }
 0x546   : > { %v1081_v2 = vmul.f32 %v1077_v35, %v1072_v43  ;;  %v1080_v45 = vmul.f32 %v1077_v35, %v1071_v34  ;;  %v1079_v39 = vmul.f32 %v1077_v35, %v1070_v36  ;;  %v1078_v40 = vmul.f32 %v1077_v35, %v1069_v37 }
 0x548   : > { %1112 = vperm.xlu1 %2295, %v1081_v2   ;;  %1107 = vperm.xlu0 %2293, %v1080_v45   ;;  %v1090_v41 = vmul.f32 %v1086_v38, %v1081_v2  ;;  %v1089_v42 = vmul.f32 %v1086_v38, %v1080_v45  ;;  %v1088_v50 = vmul.f32 %v1086_v38, %v1079_v39 }
 0x549   : > { %v1087_v51 = vmul.f32 %v1086_v38, %v1078_v40 }
 0x54a   : > { %v1094_v48 = vsub.f32 %v1085_v44, %v1090_v41  ;;  %v1093_v49 = vsub.f32 %v1084_v47, %v1089_v42  ;;  %v1092_v53 = vsub.f32 %v1083_v46, %v1088_v50 }
 0x54b   : > { %v1091_v55 = vsub.f32 %v1082_v52, %v1087_v51 }
 0x54c   : > { %1102 = vperm.xlu1 %2295, %v1079_v39   ;;  %1097 = vperm.xlu0 %2293, %v1078_v40  }
 0x550   : > { %1136 = vperm.xlu1 %2295, %v1094_v48   ;;  %1131 = vperm.xlu0 %2293, %v1093_v49  }
 0x554   : > { %1126 = vperm.xlu1 %2295, %v1092_v53   ;;  %1121 = vperm.xlu0 %2293, %v1091_v55  }
 0x5c3   : > { %v1113_v56 = vpop.permute.xlu1 %1112  ;;  %v1108_v57 = vpop.permute.xlu0 %1107 }
 0x5c4   : > { %v1118_v0 = vmul.f32 %v2803_v63, %v1113_v56  ;;  %v1117_v3 = vmul.f32 %v2799_v61, %v1108_v57 }
 0x5c7   : > { %v1103_v59 = vpop.permute.xlu1 %1102  ;;  %v1098_v60 = vpop.permute.xlu0 %1097 }
 0x5c8   : > { %v1116_v9 = vmul.f32 %v1103_v59, %v2807_v1  ;;  %v1115_v10 = vmul.f32 %v1098_v60, %v2801_v62  ;;  %v2418_v62 = vld [vmem:[%s3243_s7] sm:$0xff]  }
 0x5c9   : > { %2162 = vmatprep.mubr.msk.bf16.mxu1 %vm1195_vm3, %v2418_v62 }
 0x5cb   : > { %v1137_v4 = vpop.permute.xlu1 %1136  ;;  %v1132_v5 = vpop.permute.xlu0 %1131 }
 0x5cc   : > { %v1142_v6 = vadd.f32 %v1137_v4, %v1118_v0  ;;  %v1141_v7 = vadd.f32 %v1132_v5, %v1117_v3 }
 0x5ce   : > { %v1146_v11 = vmax.f32 %v1142_v6, 0.0  ;;  %v1145_v14 = vmax.f32 %v1141_v7, 0.0 }
 0x5cf   : > { %v1127_v16 = vpop.permute.xlu1 %1126  ;;  %v1122_v12 = vpop.permute.xlu0 %1121 }
 0x5d0   : > { %v1140_v13 = vadd.f32 %v1127_v16, %v1116_v9  ;;  %v1139_v17 = vadd.f32 %v1122_v12, %v1115_v10  ;;  %v2316_v18 = vpack.i.bf16 %v1146_v11, %v1145_v14  ;;  %v1176_v19 = vpack.c.bf16 %v1146_v11, %v1145_v14 }
 0x5d2   : > { %v1144_v20 = vmax.f32 %v1140_v13, 0.0  ;;  %v1143_v63 = vmax.f32 %v1139_v17, 0.0  ;;  %2317 = vrot.lane.b32.xlu0 %v2316_v18, %s3269_s30  ;;  %v1301_v13 = vld [vmem:[%s3244_s8 + $0x18] sm:$0xff]  ;;  %v1300_v17 = vld [vmem:[%s3244_s8 + $0x10] sm:$0xff] }
 0x5d4   : > { %v2321_v61 = vpack.i.bf16 %v1144_v20, %v1143_v63  ;;  %v1175_v21 = vpack.c.bf16 %v1144_v20, %v1143_v63  ;;  %v1299_v63 = vld [vmem:[%s3244_s8 + $0x8] sm:$0xff] }
 0x5d6   : > { %2327 = vrot.lane.b32.xlu0 %v2316_v18, %s3293_s29  ;;  %2322 = vrot.lane.b32.xlu1 %v2321_v61, %s3269_s30 }
 0x5da   : > { %2332 = vrot.lane.b32.xlu1 %v2321_v61, %s3293_s29  ;;  %v1298_v61 = vld [vmem:[%s3244_s8] sm:$0xff] }
 0x644   : > { %v2318_v1 = vpop.permute.xlu0 %2317 }
 0x645   : > { %v2320_v22 = vunpack.i.h.bf16 %v2318_v1  ;;  %v2319_v24 = vunpack.i.l.bf16 %v2318_v1 }
 0x647   : > { %v1180_v54 = vpack.c.bf16 %v2320_v22, %v2319_v24 }
 0x648   : > { %v2323_v25 = vpop.permute.xlu1 %2322  ;;  %v2328_v15 = vpop.permute.xlu0 %2327 }
 0x649   : > { %v2325_v26 = vunpack.i.h.bf16 %v2323_v25  ;;  %v2324_v23 = vunpack.i.l.bf16 %v2323_v25  ;;  %v2330_v27 = vunpack.i.h.bf16 %v2328_v15  ;;  %v2329_v58 = vunpack.i.l.bf16 %v2328_v15  ;;  %2150 = vmatprep.subr.bf16.mxu1 %v1180_v54  ;;  %v1313_v25 = vld [vmem:[%s3245_s9 + $0x10] sm:$0xff] }
 0x64a   : > { %2151 = vmatpush3.bf16.msra.mxu1 %v1180_v54  ;;  %v1314_v54 = vld [vmem:[%s3245_s9 + $0x18] sm:$0xff] }
 0x64b   : > { %v1179_v28 = vpack.c.bf16 %v2325_v26, %v2324_v23  ;;  %v1178_v30 = vpack.c.bf16 %v2330_v27, %v2329_v58  ;;  %v1312_v58 = vld [vmem:[%s3245_s9 + $0x8] sm:$0xff] }
 0x64c   : > { %v2333_v29 = vpop.permute.xlu1 %2332 }
 0x64d   : > { %v2335_v8 = vunpack.i.h.bf16 %v2333_v29  ;;  %v2334_v31 = vunpack.i.l.bf16 %v2333_v29  ;;  %2152 = vmatprep.subr.bf16.mxu1 %v1179_v28 }
 0x64e   : > { %2153 = vmatpush3.bf16.msra.mxu1 %v1179_v28  ;;  %v1311_v28 = vld [vmem:[%s3245_s9] sm:$0xff] }
 0x64f   : > { %2154 = vmatprep.subr.bf16.mxu1 %v1178_v30  ;;  %v1177_v32 = vpack.c.bf16 %v2335_v8, %v2334_v31 }
 0x652   : > { %2155 = vmatpush3.bf16.msra.mxu1 %v1178_v30 }
 0x653   : > { %2156 = vmatprep.subr.bf16.mxu1 %v1177_v32 }
 0x656   : > { %2157 = vmatpush3.bf16.msra.mxu1 %v1177_v32 }
 0x657   : > { %2158 = vmatprep.subr.bf16.mxu1 %v1176_v19 }
 0x65a   : > { %2159 = vmatpush3.bf16.msra.mxu1 %v1176_v19 }
 0x65b   : > { %2160 = vmatprep.subr.bf16.mxu1 %v1175_v21 }
 0x65e   : > { %2161 = vmatpush3.bf16.msra.mxu1 %v1175_v21 }
 0x661   : > { %2163 = vmatmul.mubr.msk.bf16.vlgmr.msra.gmra.mxu1 %vm1195_vm3, %v2419_v33 }
 0x721   : > { %v2867_v43 = vpop.f32.mrf.mxu1 }
 0x722   : > { %v1271_v36 = vmul.f32 %v2867_v43, %v2867_v43  ;;  %v1255_v41 = vsel %vm1251_vm4, %v2867_v43, 0.0 }
 0x723   : > { %v2869_v34 = vpop.f32.mrf.mxu1 }
 0x724   : > { %v1269_v2 = vmul.f32 %v2869_v34, %v2869_v34  ;;  %v1252_v37 = vsel %vm1251_vm4, %v2869_v34, 0.0  ;;  %v1276_v51 = vsel %vm1251_vm4, %v1271_v36, 0.0 }
 0x725   : > { %v2871_v35 = vpop.f32.mrf.mxu1 }
 0x726   : > { %v1273_v42 = vsel %vm1251_vm4, %v1269_v2, 0.0  ;;  %v1272_v44 = vmul.f32 %v2871_v35, %v2871_v35  ;;  %v1257_v50 = vsel %vm1251_vm4, %v2871_v35, 0.0 }
 0x727   : > { %v2875_v45 = vpop.f32.mrf.mxu1 }
 0x728   : > { %v1253_v38 = vsel %vm1251_vm4, %v2875_v45, 0.0  ;;  %v1270_v39 = vmul.f32 %v2875_v45, %v2875_v45  ;;  %v1278_v53 = vsel %vm1251_vm4, %v1272_v44, 0.0 }
 0x729   : > { %v1254_v40 = vadd.f32 %v1253_v38, %v1252_v37 }
 0x72a   : > { %v1274_v47 = vsel %vm1251_vm4, %v1270_v39, 0.0 }
 0x72b   : > { %v1256_v48 = vadd.f32 %v1255_v41, %v1254_v40  ;;  %v1275_v49 = vadd.f32 %v1274_v47, %v1273_v42 }
 0x72d   : > { %v1258_v46 = vadd.f32 %v1257_v50, %v1256_v48  ;;  %v1277_v52 = vadd.f32 %v1276_v51, %v1275_v49 }
 0x72f   : > { %1259 = vadd.xlane.f32.xlu0 %v1258_v46  ;;  %v1279_v55 = vadd.f32 %v1278_v53, %v1277_v52 }
 0x731   : > { %1280 = vadd.xlane.f32.xlu1 %v1279_v55 }
 0x7b8   : > { %v1260_v56 = vpop.xlane.xlu0 %1259 }
 0x7b9   : > { %v1261_v57 = vrot.slane %v1260_v56, 4 }
 0x7ba   : > { %v1281_v59 = vpop.xlane.xlu1 %1280 }
 0x7bb   : > { %v1262_v60 = vadd.f32 %v1261_v57, %v1260_v56  ;;  %v1282_v0 = vrot.slane %v1281_v59, 4 }
 0x7bd   : > { %v1263_v3 = vrot.slane %v1262_v60, 2  ;;  %v1283_v4 = vadd.f32 %v1282_v0, %v1281_v59 }
 0x7bf   : > { %v1284_v5 = vrot.slane %v1283_v4, 2  ;;  %v1264_v6 = vadd.f32 %v1263_v3, %v1262_v60 }
 0x7c1   : > { %v1265_v7 = vrot.slane %v1264_v6, 1  ;;  %v1285_v9 = vadd.f32 %v1284_v5, %v1283_v4 }
 0x7c3   : > { %v1266_v10 = vadd.f32 %v1265_v7, %v1264_v6  ;;  %v1286_v11 = vrot.slane %v1285_v9, 1 }
 0x7c5   : > { %2214 = vpush %v1266_v10  ;;  %v1287_v14 = vadd.f32 %v1286_v11, %v1285_v9 }
 0x7c7   : > { %2216 = vpush %v1287_v14 }
 0x7f6   : > { %s2215_s16 = spop %2214 }
 0x7f7   : > { %s1292_s17 = smul.f32 0.00052083336, %s2215_s16 }
 0x7f8   : > { %s2217_s27 = spop %2216 }
 0x7f9   : > { %s1296_s1 = smul.f32 %s1292_s17, %s1292_s17  ;;  %v1315_v21 = vstv %s1292_s17 }
 0x7fa   : > { %s1295_s20 = smul.f32 0.00052083336, %s2217_s27  ;;  %s3273_s27 = smov 2  }
 0x7fc   : > { %s1297_s23 = ssub.f32 %s1295_s20, %s1296_s1  ;;  %s3271_s1 = smov 1  }
 0x7fe   : > { %s1302_s0 = sadd.f32 1e-05, %s1297_s23 }
 0x800   : > { %v1303_v16 = vstv %s1302_s0 }
 0x801   : > { %2428 = vrsqrt.f32 %v1303_v16 }
 0x80e   : > { %v2429_v12 = vpop.eup %2428 }
 0x80f   : > { %2218 = vpush %v2429_v12 }
 0x840   : > { %s2219_s19 = spop %2218 }
 0x841   : > { %v1306_v18 = vstv %s2219_s19  ;;  %s2920_s19 = sand.u32 1, %s2516_s25  }
 0x842   : > { %v1310_v19 = vmul.f32 %v1306_v18, %v1301_v13  ;;  %v1309_v20 = vmul.f32 %v1306_v18, %v1300_v17  ;;  %v1308_v62 = vmul.f32 %v1306_v18, %v1299_v63  ;;  %v1307_v1 = vmul.f32 %v1306_v18, %v1298_v61  ;;  %s3268_s24 = sshll.u32 %s2920_s19, 5 }
 0x843   : > { %s2939_s16 = scalar_lea.vmem [#allocation2], %s3268_s24  ;;  %s3275_s24 = sshll.u32 %s2649_s28, 9 }
 0x844   : > { %1341 = vperm.xlu1 %2295, %v1310_v19   ;;  %1336 = vperm.xlu0 %2293, %v1309_v20   ;;  %v1319_v22 = vmul.f32 %v1315_v21, %v1310_v19  ;;  %v1318_v24 = vmul.f32 %v1315_v21, %v1309_v20  ;;  %v1317_v23 = vmul.f32 %v1315_v21, %v1308_v62 }
 0x845   : > { %v1316_v27 = vmul.f32 %v1315_v21, %v1307_v1 }
 0x846   : > { %v1323_v15 = vsub.f32 %v1314_v54, %v1319_v22  ;;  %v1322_v26 = vsub.f32 %v1313_v25, %v1318_v24  ;;  %v1321_v29 = vsub.f32 %v1312_v58, %v1317_v23 }
 0x847   : > { %v1320_v30 = vsub.f32 %v1311_v28, %v1316_v27 }
 0x848   : > { %1331 = vperm.xlu1 %2295, %v1308_v62   ;;  %1326 = vperm.xlu0 %2293, %v1307_v1   ;;  %v2420_v62 = vld [vmem:[%s3246_s10] sm:$0xff]  }
 0x849   : > { %2178 = vmatprep.mubr.msk.bf16.mxu1 %vm1195_vm3, %v2420_v62 }
 0x84c   : > { %1365 = vperm.xlu1 %2295, %v1323_v15   ;;  %1360 = vperm.xlu0 %2293, %v1322_v26  }
 0x850   : > { %1355 = vperm.xlu1 %2295, %v1321_v29   ;;  %1350 = vperm.xlu0 %2293, %v1320_v30  }
 0x8bf   : > { %v1342_v8 = vpop.permute.xlu1 %1341  ;;  %v1337_v31 = vpop.permute.xlu0 %1336 }
 0x8c0   : > { %v1347_v2 = vmul.f32 %v2871_v35, %v1342_v8  ;;  %v1346_v36 = vmul.f32 %v2867_v43, %v1337_v31 }
 0x8c3   : > { %v1332_v32 = vpop.permute.xlu1 %1331  ;;  %v1327_v33 = vpop.permute.xlu0 %1326 }
 0x8c4   : > { %v1345_v41 = vmul.f32 %v1332_v32, %v2875_v45  ;;  %v1344_v42 = vmul.f32 %v1327_v33, %v2869_v34  ;;  %v2421_v33 = vld [vmem:[%s3246_s10 + $0x8] sm:$0xff]  }
 0x8c7   : > { %v1366_v37 = vpop.permute.xlu1 %1365  ;;  %v1361_v38 = vpop.permute.xlu0 %1360 }
 0x8c8   : > { %v1371_v39 = vadd.f32 %v1366_v37, %v1347_v2  ;;  %v1370_v40 = vadd.f32 %v1361_v38, %v1346_v36 }
 0x8ca   : > { %v2927_v44 = vmax.f32 %v1371_v39, 0.0  ;;  %v2929_v47 = vmax.f32 %v1370_v40, 0.0 }
 0x8cb   : > { %v1356_v48 = vpop.permute.xlu1 %1355  ;;  %v1351_v49 = vpop.permute.xlu0 %1350 }
 0x8cc   : > { %v1923_v35 = vsel %vm1251_vm4, %v2927_v44, 0.0  ;;  %v1922_v43 = vsel %vm1251_vm4, %v2929_v47, 0.0  ;;  %v1369_v50 = vadd.f32 %v1356_v48, %v1345_v41  ;;  %v1368_v51 = vadd.f32 %v1351_v49, %v1344_v42 }
 0x8cd   : > { %v2341_v46 = vpack.i.bf16 %v2927_v44, %v2929_v47  ;;  %1926 = vst [vmem:[%s2939_s16 + $0x10] sm:$0xff] %v1922_v43  ;;  %1927 = vst [vmem:[%s2939_s16 + $0x18] sm:$0xff] %v1923_v35 }
 0x8ce   : > { %v2943_v34 = vmax.f32 %v1369_v50, 0.0  ;;  %v2945_v45 = vmax.f32 %v1368_v51, 0.0 }
 0x8cf   : > { %2342 = vrot.lane.b32.xlu1 %v2341_v46, %s3273_s27  ;;  %2337 = vrot.lane.b32.xlu0 %v2341_v46, %s3271_s1 }
 0x8d0   : > { %v1921_v52 = vsel %vm1251_vm4, %v2943_v34, 0.0  ;;  %v1920_v53 = vsel %vm1251_vm4, %v2945_v45, 0.0  ;;  %v2351_v55 = vpack.i.bf16 %v2943_v34, %v2945_v45 }
 0x8d1   : > { %1924 = vst [vmem:[%s2939_s16] sm:$0xff] %v1920_v53  ;;  %1925 = vst [vmem:[%s2939_s16 + $0x8] sm:$0xff] %v1921_v52 }
 0x8d3   : > { %2352 = vrot.lane.b32.xlu1 %v2351_v55, %s3273_s27  ;;  %2347 = vrot.lane.b32.xlu0 %v2351_v55, %s3271_s1 }
 0x941   : > { %v2343_v56 = vpop.permute.xlu1 %2342  ;;  %v2338_v57 = vpop.permute.xlu0 %2337 }
 0x942   : > { %v2345_v59 = vunpack.i.h.bf16 %v2343_v56  ;;  %v2344_v60 = vunpack.i.l.bf16 %v2343_v56  ;;  %v2340_v0 = vunpack.i.h.bf16 %v2338_v57  ;;  %v2339_v3 = vunpack.i.l.bf16 %v2338_v57 }
 0x944   : > { %v1408_v4 = vsel %vm1404_vm5, %v2927_v44, %v2340_v0  ;;  %v1407_v5 = vsel %vm1404_vm5, %v2929_v47, %v2339_v3 }
 0x945   : > { %v2353_v6 = vpop.permute.xlu1 %2352  ;;  %v2348_v7 = vpop.permute.xlu0 %2347  ;;  %v1412_v9 = vsel %vm1409_vm6, %v1407_v5, %v2344_v60  ;;  %v1413_v10 = vsel %vm1409_vm6, %v1408_v4, %v2345_v59 }
 0x946   : > { %v2355_v11 = vunpack.i.h.bf16 %v2353_v6  ;;  %v2354_v14 = vunpack.i.l.bf16 %v2353_v6  ;;  %v2350_v16 = vunpack.i.h.bf16 %v2348_v7  ;;  %v2349_v12 = vunpack.i.l.bf16 %v2348_v7 }
 0x947   : > { %v2356_v13 = vpack.i.bf16 %v1413_v10, %v1412_v9  ;;  %v1443_v17 = vpack.c.bf16 %v1413_v10, %v1412_v9 }
 0x948   : > { %v1406_v18 = vsel %vm1404_vm5, %v2943_v34, %v2350_v16  ;;  %v1405_v19 = vsel %vm1404_vm5, %v2945_v45, %v2349_v12 }
 0x949   : > { %2357 = vrot.lane.b32.xlu0 %v2356_v13, %s3269_s30  ;;  %v1410_v20 = vsel %vm1409_vm6, %v1405_v19, %v2354_v14  ;;  %v1411_v63 = vsel %vm1409_vm6, %v1406_v18, %v2355_v11 }
 0x94a   : > { %v2361_v61 = vpack.i.bf16 %v1411_v63, %v1410_v20  ;;  %v1442_v21 = vpack.c.bf16 %v1411_v63, %v1410_v20  ;;  %v1566_v20 = vld [vmem:[%s3247_s11 + $0x18] sm:$0xff]  ;;  %v1565_v63 = vld [vmem:[%s3247_s11 + $0x10] sm:$0xff] }
 0x94c   : > { %2362 = vrot.lane.b32.xlu1 %v2361_v61, %s3269_s30 }
 0x94d   : > { %2367 = vrot.lane.b32.xlu0 %v2356_v13, %s3293_s29 }
 0x950   : > { %2372 = vrot.lane.b32.xlu1 %v2361_v61, %s3293_s29 }
 0x9bb   : > { %v2358_v1 = vpop.permute.xlu0 %2357 }
 0x9bc   : > { %v2360_v22 = vunpack.i.h.bf16 %v2358_v1  ;;  %v2359_v24 = vunpack.i.l.bf16 %v2358_v1  ;;  %v1564_v1 = vld [vmem:[%s3247_s11 + $0x8] sm:$0xff] }
 0x9be   : > { %v1447_v54 = vpack.c.bf16 %v2360_v22, %v2359_v24  ;;  %v2363_v25 = vpop.permute.xlu1 %2362  ;;  %v1563_v22 = vld [vmem:[%s3247_s11] sm:$0xff] }
 0x9bf   : > { %v2365_v15 = vunpack.i.h.bf16 %v2363_v25  ;;  %v2364_v26 = vunpack.i.l.bf16 %v2363_v25  ;;  %v2368_v23 = vpop.permute.xlu0 %2367 }
 0x9c0   : > { %v2370_v27 = vunpack.i.h.bf16 %v2368_v23  ;;  %v2369_v58 = vunpack.i.l.bf16 %v2368_v23  ;;  %2166 = vmatprep.subr.bf16.mxu1 %v1447_v54  ;;  %v1579_v23 = vld [vmem:[%s3248_s12 + $0x18] sm:$0xff] }
 0x9c1   : > { %v1446_v28 = vpack.c.bf16 %v2365_v15, %v2364_v26  ;;  %2167 = vmatpush3.bf16.msra.mxu1 %v1447_v54 }
 0x9c2   : > { %v2373_v29 = vpop.permute.xlu1 %2372  ;;  %v1445_v30 = vpack.c.bf16 %v2370_v27, %v2369_v58  ;;  %v1578_v27 = vld [vmem:[%s3248_s12 + $0x10] sm:$0xff] }
 0x9c3   : > { %2168 = vmatprep.subr.bf16.mxu1 %v1446_v28  ;;  %v2375_v8 = vunpack.i.h.bf16 %v2373_v29  ;;  %v2374_v31 = vunpack.i.l.bf16 %v2373_v29 }
 0x9c5   : > { %2169 = vmatpush3.bf16.msra.mxu1 %v1446_v28  ;;  %v1444_v32 = vpack.c.bf16 %v2375_v8, %v2374_v31  ;;  %v1577_v8 = vld [vmem:[%s3248_s12 + $0x8] sm:$0xff]  ;;  %v1576_v31 = vld [vmem:[%s3248_s12] sm:$0xff] }
 0x9c6   : > { %2170 = vmatprep.subr.bf16.mxu1 %v1445_v30 }
 0x9c9   : > { %2171 = vmatpush3.bf16.msra.mxu1 %v1445_v30 }
 0x9ca   : > { %2172 = vmatprep.subr.bf16.mxu1 %v1444_v32 }
 0x9cd   : > { %2173 = vmatpush3.bf16.msra.mxu1 %v1444_v32 }
 0x9ce   : > { %2174 = vmatprep.subr.bf16.mxu1 %v1443_v17 }
 0x9d1   : > { %2175 = vmatpush3.bf16.msra.mxu1 %v1443_v17 }
 0x9d2   : > { %2176 = vmatprep.subr.bf16.mxu1 %v1442_v21 }
 0x9d5   : > { %2177 = vmatpush3.bf16.msra.mxu1 %v1442_v21 }
 0x9d8   : > { %2179 = vmatmul.mubr.msk.bf16.vlgmr.msra.gmra.mxu1 %vm1195_vm3, %v2421_v33 }
 0xa98   : > { %v2983_v2 = vpop.f32.mrf.mxu1 }
 0xa99   : > { %v1536_v40 = vmul.f32 %v2983_v2, %v2983_v2  ;;  %v1520_v35 = vsel %vm1251_vm4, %v2983_v2, 0.0 }
 0xa9a   : > { %v2985_v36 = vpop.f32.mrf.mxu1 }
 0xa9b   : > { %v1534_v38 = vmul.f32 %v2985_v36, %v2985_v36  ;;  %v1517_v41 = vsel %vm1251_vm4, %v2985_v36, 0.0  ;;  %v1541_v55 = vsel %vm1251_vm4, %v1536_v40, 0.0 }
 0xa9c   : > { %v2987_v37 = vpop.f32.mrf.mxu1 }
 0xa9d   : > { %v1538_v43 = vsel %vm1251_vm4, %v1534_v38, 0.0  ;;  %v1537_v50 = vmul.f32 %v2987_v37, %v2987_v37  ;;  %v1522_v53 = vsel %vm1251_vm4, %v2987_v37, 0.0 }
 0xa9e   : > { %v2991_v39 = vpop.f32.mrf.mxu1 }
 0xa9f   : > { %v1518_v42 = vsel %vm1251_vm4, %v2991_v39, 0.0  ;;  %v1535_v48 = vmul.f32 %v2991_v39, %v2991_v39  ;;  %v1543_v59 = vsel %vm1251_vm4, %v1537_v50, 0.0 }
 0xaa0   : > { %v1519_v49 = vadd.f32 %v1518_v42, %v1517_v41 }
 0xaa1   : > { %v1539_v51 = vsel %vm1251_vm4, %v1535_v48, 0.0 }
 0xaa2   : > { %v1540_v46 = vadd.f32 %v1539_v51, %v1538_v43  ;;  %v1521_v52 = vadd.f32 %v1520_v35, %v1519_v49 }
 0xaa4   : > { %v1523_v56 = vadd.f32 %v1522_v53, %v1521_v52  ;;  %v1542_v57 = vadd.f32 %v1541_v55, %v1540_v46 }
 0xaa6   : > { %1524 = vadd.xlane.f32.xlu0 %v1523_v56  ;;  %v1544_v60 = vadd.f32 %v1543_v59, %v1542_v57 }
 0xaa8   : > { %1545 = vadd.xlane.f32.xlu1 %v1544_v60 }
 0xb2f   : > { %v1525_v0 = vpop.xlane.xlu0 %1524 }
 0xb30   : > { %v1526_v3 = vrot.slane %v1525_v0, 4 }
 0xb31   : > { %v1546_v4 = vpop.xlane.xlu1 %1545 }
 0xb32   : > { %v1527_v5 = vadd.f32 %v1526_v3, %v1525_v0  ;;  %v1547_v6 = vrot.slane %v1546_v4, 4 }
 0xb34   : > { %v1528_v7 = vrot.slane %v1527_v5, 2  ;;  %v1548_v9 = vadd.f32 %v1547_v6, %v1546_v4 }
 0xb36   : > { %v1549_v10 = vrot.slane %v1548_v9, 2  ;;  %v1529_v11 = vadd.f32 %v1528_v7, %v1527_v5 }
 0xb38   : > { %v1530_v14 = vrot.slane %v1529_v11, 1  ;;  %v1550_v16 = vadd.f32 %v1549_v10, %v1548_v9 }
 0xb3a   : > { %v1531_v12 = vadd.f32 %v1530_v14, %v1529_v11  ;;  %v1551_v13 = vrot.slane %v1550_v16, 1 }
 0xb3c   : > { %2220 = vpush %v1531_v12  ;;  %v1552_v17 = vadd.f32 %v1551_v13, %v1550_v16 }
 0xb3e   : > { %2222 = vpush %v1552_v17 }
 0xb6d   : > { %s2221_s17 = spop %2220 }
 0xb6e   : > { %s1557_s18 = smul.f32 0.00052083336, %s2221_s17  ;;  %s3294_s17 = smov 2  }
 0xb6f   : > { %s2223_s26 = spop %2222 }
 0xb70   : > { %s1561_s22 = smul.f32 %s1557_s18, %s1557_s18  ;;  %v1580_v24 = vstv %s1557_s18 }
 0xb71   : > { %s1560_s20 = smul.f32 0.00052083336, %s2223_s26  ;;  %s3295_s26 = smov 1  }
 0xb73   : > { %s1562_s23 = ssub.f32 %s1560_s20, %s1561_s22  ;;  %s3296_s22 = smov 126  }
 0xb75   : > { %s1567_s0 = sadd.f32 1e-05, %s1562_s23 }
 0xb77   : > { %v1568_v18 = vstv %s1567_s0 }
 0xb78   : > { %2430 = vrsqrt.f32 %v1568_v18 }
 0xb85   : > { %v2431_v19 = vpop.eup %2430 }
 0xb86   : > { %2224 = vpush %v2431_v19 }
 0xbb7   : > { %s2225_s27 = spop %2224 }
 0xbb8   : > { %v1571_v61 = vstv %s2225_s27 }
 0xbb9   : > { %v1575_v21 = vmul.f32 %v1571_v61, %v1566_v20  ;;  %v1574_v62 = vmul.f32 %v1571_v61, %v1565_v63  ;;  %v1573_v54 = vmul.f32 %v1571_v61, %v1564_v1  ;;  %v1572_v25 = vmul.f32 %v1571_v61, %v1563_v22 }
 0xbbb   : > { %1606 = vperm.xlu1 %2295, %v1575_v21   ;;  %1601 = vperm.xlu0 %2293, %v1574_v62   ;;  %v1584_v15 = vmul.f32 %v1580_v24, %v1575_v21  ;;  %v1583_v26 = vmul.f32 %v1580_v24, %v1574_v62  ;;  %v1582_v29 = vmul.f32 %v1580_v24, %v1573_v54 }
 0xbbc   : > { %v1581_v30 = vmul.f32 %v1580_v24, %v1572_v25 }
 0xbbd   : > { %v1588_v58 = vsub.f32 %v1579_v23, %v1584_v15  ;;  %v1587_v28 = vsub.f32 %v1578_v27, %v1583_v26  ;;  %v1586_v32 = vsub.f32 %v1577_v8, %v1582_v29  ;;  %v2422_v23 = vld [vmem:[%s3249_s13] sm:$0xff]  }
 0xbbe   : > { %v1585_v33 = vsub.f32 %v1576_v31, %v1581_v30  ;;  %2194 = vmatprep.mubr.msk.bf16.mxu0 %vm1195_vm3, %v2422_v23 }
 0xbbf   : > { %1596 = vperm.xlu1 %2295, %v1573_v54   ;;  %1591 = vperm.xlu0 %2293, %v1572_v25  }
 0xbc3   : > { %1630 = vperm.xlu1 %2295, %v1588_v58   ;;  %1625 = vperm.xlu0 %2293, %v1587_v28  }
 0xbc7   : > { %1620 = vperm.xlu1 %2295, %v1586_v32   ;;  %1615 = vperm.xlu0 %2293, %v1585_v33  }
 0xc36   : > { %v1607_v38 = vpop.permute.xlu1 %1606  ;;  %v1602_v40 = vpop.permute.xlu0 %1601 }
 0xc37   : > { %v1612_v48 = vmul.f32 %v2987_v37, %v1607_v38  ;;  %v1611_v49 = vmul.f32 %v2983_v2, %v1602_v40 }
 0xc3a   : > { %v1597_v41 = vpop.permute.xlu1 %1596  ;;  %v1592_v42 = vpop.permute.xlu0 %1591 }
 0xc3b   : > { %v1610_v46 = vmul.f32 %v1597_v41, %v2991_v39  ;;  %v1609_v52 = vmul.f32 %v1592_v42, %v2985_v36 }
 0xc3e   : > { %v1631_v35 = vpop.permute.xlu1 %1630  ;;  %v1626_v43 = vpop.permute.xlu0 %1625 }
 0xc3f   : > { %v1636_v50 = vadd.f32 %v1631_v35, %v1612_v48  ;;  %v1635_v51 = vadd.f32 %v1626_v43, %v1611_v49  ;;  %v2423_v43 = vld [vmem:[%s3249_s13 + $0x8] sm:$0xff]  }
 0xc41   : > { %v1640_v53 = vmax.f32 %v1636_v50, 0.0  ;;  %v1639_v55 = vmax.f32 %v1635_v51, 0.0 }
 0xc42   : > { %v1621_v56 = vpop.permute.xlu1 %1620  ;;  %v1616_v57 = vpop.permute.xlu0 %1615 }
 0xc43   : > { %v1644_v59 = vadd.f32 %v1640_v53, %v2927_v44  ;;  %v1643_v60 = vadd.f32 %v1639_v55, %v2929_v47  ;;  %v1634_v0 = vadd.f32 %v1621_v56, %v1610_v46  ;;  %v1633_v37 = vadd.f32 %v1616_v57, %v1609_v52 }
 0xc45   : > { %v3041_v3 = vmul.f32 0.70710677, %v1644_v59  ;;  %v3043_v2 = vmul.f32 0.70710677, %v1643_v60  ;;  %v1638_v4 = vmax.f32 %v1634_v0, 0.0  ;;  %v1637_v5 = vmax.f32 %v1633_v37, 0.0 }
 0xc47   : > { %v1642_v39 = vadd.f32 %v1638_v4, %v2943_v34  ;;  %v1641_v36 = vadd.f32 %v1637_v5, %v2945_v45  ;;  %v2381_v6 = vpack.i.bf16 %v3041_v3, %v3043_v2 }
 0xc49   : > { %v3049_v7 = vmul.f32 0.70710677, %v1642_v39  ;;  %v3051_v44 = vmul.f32 0.70710677, %v1641_v36  ;;  %2382 = vrot.lane.b32.xlu1 %v2381_v6, %s3294_s17  ;;  %2377 = vrot.lane.b32.xlu0 %v2381_v6, %s3295_s26 }
 0xc4b   : > { %v2391_v47 = vpack.i.bf16 %v3049_v7, %v3051_v44 }
 0xc4d   : > { %2392 = vrot.lane.b32.xlu1 %v2391_v47, %s3294_s17  ;;  %2387 = vrot.lane.b32.xlu0 %v2391_v47, %s3295_s26 }
 0xcbb   : > { %v2383_v34 = vpop.permute.xlu1 %2382  ;;  %v2378_v45 = vpop.permute.xlu0 %2377 }
 0xcbc   : > { %v2385_v9 = vunpack.i.h.bf16 %v2383_v34  ;;  %v2384_v10 = vunpack.i.l.bf16 %v2383_v34  ;;  %v2380_v11 = vunpack.i.h.bf16 %v2378_v45  ;;  %v2379_v14 = vunpack.i.l.bf16 %v2378_v45 }
 0xcbe   : > { %v1680_v16 = vsel %vm1404_vm5, %v3041_v3, %v2380_v11  ;;  %v1679_v12 = vsel %vm1404_vm5, %v3043_v2, %v2379_v14 }
 0xcbf   : > { %v2393_v13 = vpop.permute.xlu1 %2392  ;;  %v2388_v17 = vpop.permute.xlu0 %2387  ;;  %v1683_v18 = vsel %vm1409_vm6, %v1679_v12, %v2384_v10  ;;  %v1684_v19 = vsel %vm1409_vm6, %v1680_v16, %v2385_v9 }
 0xcc0   : > { %v2395_v20 = vunpack.i.h.bf16 %v2393_v13  ;;  %v2394_v63 = vunpack.i.l.bf16 %v2393_v13  ;;  %v2390_v61 = vunpack.i.h.bf16 %v2388_v17  ;;  %v2389_v21 = vunpack.i.l.bf16 %v2388_v17 }
 0xcc1   : > { %v2396_v62 = vpack.i.bf16 %v1684_v19, %v1683_v18  ;;  %v1714_v1 = vpack.c.bf16 %v1684_v19, %v1683_v18 }
 0xcc2   : > { %v1678_v22 = vsel %vm1404_vm5, %v3049_v7, %v2390_v61  ;;  %v1677_v24 = vsel %vm1404_vm5, %v3051_v44, %v2389_v21 }
 0xcc3   : > { %2397 = vrot.lane.b32.xlu0 %v2396_v62, %s3296_s22  ;;  %v1681_v54 = vsel %vm1409_vm6, %v1677_v24, %v2394_v63  ;;  %v1682_v25 = vsel %vm1409_vm6, %v1678_v22, %v2395_v20 }
 0xcc4   : > { %v2401_v15 = vpack.i.bf16 %v1682_v25, %v1681_v54  ;;  %v1713_v26 = vpack.c.bf16 %v1682_v25, %v1681_v54  ;;  %v1834_v54 = vld [vmem:[%s3250_s14] sm:$0xff]  ;;  %v1835_v25 = vld [vmem:[%s3250_s14 + $0x8] sm:$0xff] }
 0xcc6   : > { %2402 = vrot.lane.b32.xlu1 %v2401_v15, %s3296_s22 }
 0xcc7   : > { %2407 = vrot.lane.b32.xlu0 %v2396_v62, %s3293_s29 }
 0xcca   : > { %2412 = vrot.lane.b32.xlu1 %v2401_v15, %s3293_s29 }
 0xd35   : > { %v2398_v27 = vpop.permute.xlu0 %2397 }
 0xd36   : > { %v2400_v58 = vunpack.i.h.bf16 %v2398_v27  ;;  %v2399_v28 = vunpack.i.l.bf16 %v2398_v27  ;;  %v1837_v27 = vld [vmem:[%s3250_s14 + $0x18] sm:$0xff] }
 0xd38   : > { %v1718_v29 = vpack.c.bf16 %v2400_v58, %v2399_v28  ;;  %v2403_v30 = vpop.permute.xlu1 %2402  ;;  %v1836_v58 = vld [vmem:[%s3250_s14 + $0x10] sm:$0xff] }
 0xd39   : > { %v2405_v8 = vunpack.i.h.bf16 %v2403_v30  ;;  %v2404_v31 = vunpack.i.l.bf16 %v2403_v30  ;;  %v2408_v32 = vpop.permute.xlu0 %2407 }
 0xd3a   : > { %v2410_v33 = vunpack.i.h.bf16 %v2408_v32  ;;  %v2409_v38 = vunpack.i.l.bf16 %v2408_v32  ;;  %2182 = vmatprep.subr.bf16.mxu0 %v1718_v29  ;;  %v1848_v32 = vld [vmem:[%s3251_s15 + $0x8] sm:$0xff] }
 0xd3b   : > { %v1717_v40 = vpack.c.bf16 %v2405_v8, %v2404_v31  ;;  %2183 = vmatpush3.bf16.msra.mxu0 %v1718_v29 }
 0xd3c   : > { %v2413_v41 = vpop.permute.xlu1 %2412  ;;  %v1716_v42 = vpack.c.bf16 %v2410_v33, %v2409_v38  ;;  %v1847_v33 = vld [vmem:[%s3251_s15] sm:$0xff] }
 0xd3d   : > { %2184 = vmatprep.subr.bf16.mxu0 %v1717_v40  ;;  %v2415_v48 = vunpack.i.h.bf16 %v2413_v41  ;;  %v2414_v49 = vunpack.i.l.bf16 %v2413_v41 }
 0xd3f   : > { %2185 = vmatpush3.bf16.msra.mxu0 %v1717_v40  ;;  %v1715_v35 = vpack.c.bf16 %v2415_v48, %v2414_v49  ;;  %v1850_v48 = vld [vmem:[%s3251_s15 + $0x18] sm:$0xff]  ;;  %v1849_v49 = vld [vmem:[%s3251_s15 + $0x10] sm:$0xff] }
 0xd40   : > { %2186 = vmatprep.subr.bf16.mxu0 %v1716_v42 }
 0xd43   : > { %2187 = vmatpush3.bf16.msra.mxu0 %v1716_v42 }
 0xd44   : > { %2188 = vmatprep.subr.bf16.mxu0 %v1715_v35 }
 0xd47   : > { %2189 = vmatpush3.bf16.msra.mxu0 %v1715_v35 }
 0xd48   : > { %2190 = vmatprep.subr.bf16.mxu0 %v1714_v1 }
 0xd4b   : > { %2191 = vmatpush3.bf16.msra.mxu0 %v1714_v1 }
 0xd4c   : > { %2192 = vmatprep.subr.bf16.mxu0 %v1713_v26 }
 0xd4f   : > { %2193 = vmatpush3.bf16.msra.mxu0 %v1713_v26 }
 0xd52   : > { %2195 = vmatmul.mubr.msk.bf16.vlgmr.msra.gmra.mxu0 %vm1195_vm3, %v2423_v43 }
 0xe12   : > { %v3083_v50 = vpop.f32.mrf.mxu0 }
 0xe13   : > { %v1807_v55 = vmul.f32 %v3083_v50, %v3083_v50  ;;  %v1791_v0 = vsel %vm1251_vm4, %v3083_v50, 0.0 }
 0xe14   : > { %v3085_v51 = vpop.f32.mrf.mxu0 }
 0xe15   : > { %v1805_v52 = vmul.f32 %v3085_v51, %v3085_v51  ;;  %v1788_v56 = vsel %vm1251_vm4, %v3085_v51, 0.0  ;;  %v1812_v47 = vsel %vm1251_vm4, %v1807_v55, 0.0 }
 0xe16   : > { %v3087_v46 = vpop.f32.mrf.mxu0 }
 0xe17   : > { %v1809_v37 = vsel %vm1251_vm4, %v1805_v52, 0.0  ;;  %v1808_v4 = vmul.f32 %v3087_v46, %v3087_v46  ;;  %v1793_v6 = vsel %vm1251_vm4, %v3087_v46, 0.0 }
 0xe18   : > { %v3091_v53 = vpop.f32.mrf.mxu0 }
 0xe19   : > { %v1789_v57 = vsel %vm1251_vm4, %v3091_v53, 0.0  ;;  %v1806_v59 = vmul.f32 %v3091_v53, %v3091_v53  ;;  %v1814_v9 = vsel %vm1251_vm4, %v1808_v4, 0.0 }
 0xe1a   : > { %v1790_v60 = vadd.f32 %v1789_v57, %v1788_v56 }
 0xe1b   : > { %v1810_v5 = vsel %vm1251_vm4, %v1806_v59, 0.0 }
 0xe1c   : > { %v1811_v39 = vadd.f32 %v1810_v5, %v1809_v37  ;;  %v1792_v36 = vadd.f32 %v1791_v0, %v1790_v60 }
 0xe1e   : > { %v1794_v34 = vadd.f32 %v1793_v6, %v1792_v36  ;;  %v1813_v45 = vadd.f32 %v1812_v47, %v1811_v39 }
 0xe20   : > { %1795 = vadd.xlane.f32.xlu0 %v1794_v34  ;;  %v1815_v10 = vadd.f32 %v1814_v9, %v1813_v45 }
 0xe22   : > { %1816 = vadd.xlane.f32.xlu1 %v1815_v10 }
 0xea9   : > { %v1796_v11 = vpop.xlane.xlu0 %1795 }
 0xeaa   : > { %v1797_v14 = vrot.slane %v1796_v11, 4 }
 0xeab   : > { %v1817_v16 = vpop.xlane.xlu1 %1816 }
 0xeac   : > { %v1798_v12 = vadd.f32 %v1797_v14, %v1796_v11  ;;  %v1818_v13 = vrot.slane %v1817_v16, 4 }
 0xeae   : > { %v1799_v17 = vrot.slane %v1798_v12, 2  ;;  %v1819_v18 = vadd.f32 %v1818_v13, %v1817_v16 }
 0xeb0   : > { %v1820_v19 = vrot.slane %v1819_v18, 2  ;;  %v1800_v20 = vadd.f32 %v1799_v17, %v1798_v12 }
 0xeb2   : > { %v1801_v63 = vrot.slane %v1800_v20, 1  ;;  %v1821_v61 = vadd.f32 %v1820_v19, %v1819_v18 }
 0xeb4   : > { %v1802_v21 = vadd.f32 %v1801_v63, %v1800_v20  ;;  %v1822_v62 = vrot.slane %v1821_v61, 1 }
 0xeb6   : > { %2226 = vpush %v1802_v21  ;;  %v1823_v1 = vadd.f32 %v1822_v62, %v1821_v61 }
 0xeb8   : > { %2228 = vpush %v1823_v1 }
 0xee7   : > { %s2227_s27 = spop %2226 }
 0xee8   : > { %s1828_s1 = smul.f32 0.00052083336, %s2227_s27  ;;  %s1955_s27 = sshll.u32 %s2939_s16, 4  ;;  %s3144_s27 = int_to_ptr.vmem [resolvable:$true] %s1955_s27 }
 0xee9   : > { %s2229_s23 = spop %2228  ;;  %s2434_s26 = scalar_lea.vmem %s3144_s27, 512 }
 0xeea   : > { %s1832_s18 = smul.f32 %s1828_s1, %s1828_s1  ;;  %v1851_v28 = vstv %s1828_s1  ;;  %p2435_p11 = scmp.ne.s32.totalorder %s3144_s27, %s2434_s26 }
 0xeeb   : > { %s1831_s0 = smul.f32 0.00052083336, %s2229_s23  ;;  %s2534_s1 = smov [#allocation2]  }
 0xeec   : > { %p2436_p12 = pnand %p2435_p11, %p2666_p5  ;;  %s2438_s22 = sshll.u32 %s2534_s1, 4  ;;  %s2439_s22 = int_to_ptr.vmem [resolvable:$false] %s2438_s22 }
 0xeed   : > { %s1833_s21 = ssub.f32 %s1831_s0, %s1832_s18  ;;  %s2440_s16 = scalar_lea.vmem %s2439_s22, 1024 }
 0xeee   : > { %s3298_s0 = sld [smem:[#allocation17_spill]]  ;;  %p2437_p13 = pneg %p2436_p12 }
 0xeef   : > { %s1838_s17 = sadd.f32 1e-05, %s1833_s21  ;;  %p2441_p0 = scmp.lt.s32.totalorder %s3144_s27, %s2439_s22 }
 0xef0   : > { %p2442_p1 = scmp.lt.s32.totalorder %s2440_s16, %s2434_s26 }
 0xef1   : > { %v1839_v22 = vstv %s1838_s17  ;;  %s1937_s17 = scalar_lea.sflag [#allocation3], %s2920_s19 }
 0xef2   : > { %2432 = vrsqrt.f32 %v1839_v22  ;;  %p2443_p2 = por %p2442_p1, %p2441_p0 }
 0xef4   : > { %s3142_s21 = scalar_lea.hbm %s3298_s0, %s3275_s24  ;;  %p2444_p3 = pnand %p2443_p2, %p2437_p13 }
 0xeff   : > { %v2433_v24 = vpop.eup %2432 }
 0xf00   : > { %2230 = vpush %v2433_v24 }
 0xf31   : > { %s2231_s29 = spop %2230 }
 0xf32   : > { %v1842_v15 = vstv %s2231_s29 }
 0xf33   : > { %v1843_v26 = vmul.f32 %v1842_v15, %v1834_v54  ;;  %v1844_v23 = vmul.f32 %v1842_v15, %v1835_v25  ;;  %v1846_v29 = vmul.f32 %v1842_v15, %v1837_v27  ;;  %v1845_v8 = vmul.f32 %v1842_v15, %v1836_v58 }
 0xf35   : > { %1867 = vperm.xlu1 %2295, %v1844_v23   ;;  %1862 = vperm.xlu0 %2293, %v1843_v26   ;;  %v1853_v30 = vmul.f32 %v1851_v28, %v1844_v23  ;;  %v1852_v31 = vmul.f32 %v1851_v28, %v1843_v26  ;;  %v1855_v38 = vmul.f32 %v1851_v28, %v1846_v29 }
 0xf36   : > { %v1854_v41 = vmul.f32 %v1851_v28, %v1845_v8 }
 0xf37   : > { %v1857_v40 = vsub.f32 %v1848_v32, %v1853_v30  ;;  %v1856_v42 = vsub.f32 %v1847_v33, %v1852_v31  ;;  %v1859_v35 = vsub.f32 %v1850_v48, %v1855_v38 }
 0xf38   : > { %v1858_v43 = vsub.f32 %v1849_v49, %v1854_v41 }
 0xf39   : > { %1877 = vperm.xlu1 %2295, %v1846_v29   ;;  %1872 = vperm.xlu0 %2293, %v1845_v8  }
 0xf3d   : > { %1891 = vperm.xlu1 %2295, %v1857_v40   ;;  %1886 = vperm.xlu0 %2293, %v1856_v42  }
 0xf41   : > { %1901 = vperm.xlu1 %2295, %v1859_v35   ;;  %1896 = vperm.xlu0 %2293, %v1858_v43  }
 0xf42   : > { %2447 = shalt.err (!%p2444_p3)
}
 0xf43   : > { %s2448_s30 = scalar_lea.hbm %s3142_s21, 512  ;;  %s2452_s18 = scalar_lea.hbm %s3298_s0, 1024 }
 0xf44   : > { %p2449_p4 = scmp.ne.s32.totalorder %s3142_s21, %s2448_s30  ;;  %p2453_p9 = scmp.lt.s32.totalorder %s3142_s21, %s3298_s0 }
 0xf45   : > { %p2454_p10 = scmp.lt.s32.totalorder %s2452_s18, %s2448_s30 }
 0xf46   : > { %p2450_p7 = pnand %p2449_p4, %p2666_p5 }
 0xf47   : > { %p2455_p11 = por %p2454_p10, %p2453_p9 }
 0xf48   : > { %p2451_p8 = pneg %p2450_p7 }
 0xf4a   : > { %p2456_p12 = pnand %p2455_p11, %p2451_p8 }
 0xf4c   : > { %2459 = shalt.err (!%p2456_p12)
}
 0xf4d   : > { %s3276_s26 = smov 128   ;;  %s3277_s22 = smov 8  }
 0xf4e   : > { %2232 = dma.vmem_to_hbm [thread:$0]  (%p2666_p5), %s3144_s27, 512, %s3142_s21, %s1937_s17, %s3276_s26, %s3276_s26, %s3277_s22  }
 0xf4f   : > { %s3299_s24 = sshll.u32 %s2920_s19, 5  ;;  %s3300_s17 = sshll.u32 %s2649_s28, 9 }
 0xf50   : > { %s550_s27 = scalar_lea.vmem [#allocation4], %s3299_s24  ;;  %s3301_s29 = sld [smem:[#allocation18_spill]] }
 0xf51   : > { %s1971_s21 = sshll.u32 %s550_s27, 4  ;;  %s1942_s18 = scalar_lea.sflag [#allocation5], %s2920_s19  ;;  %s3184_s21 = int_to_ptr.vmem [resolvable:$true] %s1971_s21 }
 0xf52   : > { %s2460_s1 = scalar_lea.vmem %s3184_s21, 512  ;;  %s2537_s24 = smov [#allocation4]  }
 0xf53   : > { %p2461_p13 = scmp.ne.s32.totalorder %s3184_s21, %s2460_s1  ;;  %s2464_s26 = sshll.u32 %s2537_s24, 4  ;;  %s2465_s26 = int_to_ptr.vmem [resolvable:$false] %s2464_s26 }
 0xf54   : > { %s2466_s22 = scalar_lea.vmem %s2465_s26, 1024  ;;  %p2467_p2 = scmp.lt.s32.totalorder %s3184_s21, %s2465_s26 }
 0xf55   : > { %p2462_p0 = pnand %p2461_p13, %p2666_p5  ;;  %p2468_p3 = scmp.lt.s32.totalorder %s2466_s22, %s2460_s1 }
 0xf56   : > { %s3192_s23 = scalar_lea.hbm %s3301_s29, %s3300_s17 }
 0xf57   : > { %p2463_p1 = pneg %p2462_p0  ;;  %p2469_p4 = por %p2468_p3, %p2467_p2 }
 0xf59   : > { %p2470_p7 = pnand %p2469_p4, %p2463_p1 }
 0xfb0   : > { %v1868_v52 = vpop.permute.xlu1 %1867  ;;  %v1863_v55 = vpop.permute.xlu0 %1862 }
 0xfb1   : > { %v1881_v59 = vmul.f32 %v1868_v52, %v3091_v53  ;;  %v1880_v60 = vmul.f32 %v1863_v55, %v3085_v51 }
 0xfb4   : > { %v1878_v56 = vpop.permute.xlu1 %1877  ;;  %v1873_v57 = vpop.permute.xlu0 %1872 }
 0xfb5   : > { %v1883_v39 = vmul.f32 %v3087_v46, %v1878_v56  ;;  %v1882_v6 = vmul.f32 %v3083_v50, %v1873_v57 }
 0xfb8   : > { %v1892_v0 = vpop.permute.xlu1 %1891  ;;  %v1887_v4 = vpop.permute.xlu0 %1886 }
 0xfb9   : > { %v1905_v37 = vadd.f32 %v1892_v0, %v1881_v59  ;;  %v1904_v5 = vadd.f32 %v1887_v4, %v1880_v60 }
 0xfbb   : > { %v1909_v36 = vmax.f32 %v1905_v37, 0.0  ;;  %v1908_v47 = vmax.f32 %v1904_v5, 0.0 }
 0xfbc   : > { %v1902_v34 = vpop.permute.xlu1 %1901  ;;  %v1897_v10 = vpop.permute.xlu0 %1896 }
 0xfbd   : > { %v1913_v45 = vadd.f32 %v1909_v36, %v3049_v7  ;;  %v1907_v9 = vadd.f32 %v1902_v34, %v1883_v39  ;;  %v1912_v53 = vadd.f32 %v1908_v47, %v3051_v44  ;;  %v1906_v11 = vadd.f32 %v1897_v10, %v1882_v6 }
 0xfbf   : > { %v1917_v51 = vmul.f32 0.70710677, %v1913_v45  ;;  %v1911_v14 = vmax.f32 %v1907_v9, 0.0  ;;  %v1916_v16 = vmul.f32 0.70710677, %v1912_v53  ;;  %v1910_v12 = vmax.f32 %v1906_v11, 0.0 }
 0xfc1   : > { %v1929_v46 = vsel %vm1251_vm4, %v1917_v51, 0.0  ;;  %v1915_v13 = vadd.f32 %v1911_v14, %v3041_v3  ;;  %v1928_v7 = vsel %vm1251_vm4, %v1916_v16, 0.0  ;;  %v1914_v44 = vadd.f32 %v1910_v12, %v3043_v2 }
 0xfc2   : > { %1933 = vst [vmem:[%s550_s27 + $0x8] sm:$0xff] %v1929_v46  ;;  %1932 = vst [vmem:[%s550_s27] sm:$0xff] %v1928_v7 }
 0xfc3   : > { %v1919_v50 = vmul.f32 0.70710677, %v1915_v13  ;;  %v1918_v17 = vmul.f32 0.70710677, %v1914_v44 }
 0xfc5   : > { %v1931_v18 = vsel %vm1251_vm4, %v1919_v50, 0.0  ;;  %v1930_v3 = vsel %vm1251_vm4, %v1918_v17, 0.0 }
 0xfc6   : > { %1935 = vst [vmem:[%s550_s27 + $0x18] sm:$0xff] %v1931_v18  ;;  %1934 = vst [vmem:[%s550_s27 + $0x10] sm:$0xff] %v1930_v3 }
 0xfc7   : > { %2473 = shalt.err (!%p2470_p7)
}
 0xfc8   : > { %s2474_s28 = scalar_lea.hbm %s3192_s23, 512  ;;  %s2478_s17 = scalar_lea.hbm %s3301_s29, 1024 }
 0xfc9   : > { %p2475_p8 = scmp.ne.s32.totalorder %s3192_s23, %s2474_s28  ;;  %p2479_p11 = scmp.lt.s32.totalorder %s3192_s23, %s3301_s29 }
 0xfca   : > { %p2480_p12 = scmp.lt.s32.totalorder %s2478_s17, %s2474_s28 }
 0xfcb   : > { %p2476_p9 = pnand %p2475_p8, %p2666_p5 }
 0xfcc   : > { %p2481_p13 = por %p2480_p12, %p2479_p11 }
 0xfcd   : > { %p2477_p10 = pneg %p2476_p9 }
 0xfcf   : > { %p2482_p0 = pnand %p2481_p13, %p2477_p10 }
 0xfd1   : > { %2485 = shalt.err (!%p2482_p0)
}
 0xfd2   : > { %s3302_s26 = smov 8   ;;  %s3303_s22 = smov 128  }
 0xfd3   : > { %2233 = dma.vmem_to_hbm [thread:$0]  (%p2666_p5), %s3184_s21, 512, %s3192_s23, %s1942_s18, %s3303_s22, %s3303_s22, %s3302_s26  }
 0xfd4 PF: > { %s3304_s1 = sld [smem:[#allocation10_spill]] }
 0xfd5   : > { %s3305_s24 = sld [smem:[#allocation8_spill]] }
 0xfda   : > { %p2243_p1 = scmp.ge.s32.totalorder %s3304_s1, 2 }
 0xfdb   : > { %s1986_s27 = sand.u32 1, %s3305_s24  }
 0xfdc   : > { %p2237_p2 = pnand %p2243_p1, %p2670_p6  ;;  %s1987_s28 = scalar_lea.sflag [#allocation3], %s1986_s27 }
 0xfde   : > { %p2238_p3 = pneg %p2237_p2 }
 0xfe0   : > { %2503 = dma.done.wait (%p2238_p3), %s1987_s28, 512  }
 0xfe1   : > { %2505 = vsyncadd (%p2238_p3), %s1987_s28, 4294966784  ;;  %s1996_s17 = scalar_lea.sflag [#allocation5], %s1986_s27 }
 0xfe2   : > { %2507 = dma.done.wait (%p2238_p3), %s1996_s17, 512  }
 0xfe3   : > { %2509 = vsyncadd (%p2238_p3), %s1996_s17, 4294966784  ;;  %s3307_s27 = sld [smem:[#allocation11_spill]]  ;;  %s3310_s24 = smov %s2516_s25 }
 0xfe4   : > { %s3308_s20 = sld [smem:[#allocation9_spill]] }
 0xfe5   : > { %s3309_s26 = sld [smem:[#allocation12_spill]] }
 0xfe9   : > { %p31_p5 = scmp.ge.s32.totalorder %s3307_s27, 4  }
 0xfea   : > { %s3311_s25 = smov %s3308_s20 }
 0xfeb   :  { %33 = sbr.rel (!%p31_p5) target bundleno = 10 (0xa), region = 136 }
 0xff0   :  { %2001 = vsyncpa [#allocation3], 1 }
 0xff1   :  { %2003 = vsyncpa [#allocation3 + $0x1], 1 }
 0xff2   :  { %2004 = vsyncpa [#allocation5], 1 }
 0xff3   :  { %2006 = vsyncpa [#allocation5 + $0x1], 1 }

</bundles_post_ra>
